<compile_context>
chip_gen: v7x
topology: tpu7x:2x2x1
jax: 0.10.0
libtpu: 0.0.40
codegen_flags: <defaults>
</compile_context>

<pallas_src>
import numpy as np

import jax
import jax.numpy as jnp
from jax.experimental import pallas as pl
from jax.experimental.pallas import tpu as pltpu


EMBED_DIMS = 16
STAGE_CH = (8, 16, 32, 32)        # stem, stage1, stage2, stage3 output channels
_LANE = 128


# ----------------------------------------------------------------------------
# Synthetic backbone parameters (deterministic He-style init).
# ----------------------------------------------------------------------------
def init_params(key, embed_dims=EMBED_DIMS):
    def conv_init(k, cout, cin, ks):
        kw, kb = jax.random.split(k)
        fan_in = cin * ks * ks
        w = jax.random.normal(kw, (cout, cin, ks, ks), jnp.float32) * (2.0 / fan_in) ** 0.5
        b = jax.random.normal(kb, (cout,), jnp.float32) * 0.1
        return w, b

    keys = jax.random.split(key, 7)
    return {
        "stem":   conv_init(keys[0], STAGE_CH[0], 3, 3),
        "stage1": conv_init(keys[1], STAGE_CH[1], STAGE_CH[0], 3),
        "stage2": conv_init(keys[2], STAGE_CH[2], STAGE_CH[1], 3),
        "stage3": conv_init(keys[3], STAGE_CH[3], STAGE_CH[2], 3),
        "lat1":   conv_init(keys[4], embed_dims, STAGE_CH[1], 1),
        "lat2":   conv_init(keys[5], embed_dims, STAGE_CH[2], 1),
        "lat3":   conv_init(keys[6], embed_dims, STAGE_CH[3], 1),
    }


# ----------------------------------------------------------------------------
# Offline weight folding (done once, outside jit, in numpy).
# ----------------------------------------------------------------------------
def _fold_conv3x3_s2(w, b, w_in):
    """Fold a 3x3 / stride-2 / pad-1 conv into 3 per-row-tap GEMM matrices.

    For output row io, row-tap di reads input row (2*io + di - 1); its
    contribution is  row_vec @ A[di]  with  row_vec[w*cin + ci] = x[row, w, ci]
    and out_vec[jo*cout + co].  Column taps, stride-2 column subsampling and
    zero column padding are baked into A.
    """
    w = np.asarray(w, np.float32)
    cout, cin = w.shape[0], w.shape[1]
    wo = w_in // 2
    A = np.zeros((3, w_in * cin, wo * cout), np.float32)
    for di in range(3):
        for dj in range(3):
            for jo in range(wo):
                col = 2 * jo + dj - 1
                if 0 <= col < w_in:
                    A[di, col * cin:(col + 1) * cin, jo * cout:(jo + 1) * cout] = \
                        w[:, :, di, dj].T
    return A, np.tile(np.asarray(b, np.float32), wo)


def _fold_conv1x1(w, b, w_sp):
    """Block-diagonal fold of a 1x1 conv applied to a row of `w_sp` pixels."""
    w = np.asarray(w, np.float32)[:, :, 0, 0]            # (E, Cin)
    e, cin = w.shape
    L = np.zeros((w_sp * cin, w_sp * e), np.float32)
    for jo in range(w_sp):
        L[jo * cin:(jo + 1) * cin, jo * e:(jo + 1) * e] = w.T
    return L, np.tile(np.asarray(b, np.float32), w_sp)


def pack_params(params, H, W, embed_dims=EMBED_DIMS):
    assert H % 16 == 0 and W % 16 == 0
    conv_in_w = (W, W // 2, W // 4, W // 8)
    lat_w = (W // 4, W // 8, W // 16)

    As, bias_rows = [], []
    for name, wi in zip(("stem", "stage1", "stage2", "stage3"), conv_in_w):
        A, brow = _fold_conv3x3_s2(*params[name], wi)
        assert brow.size <= _LANE
        As.append(jnp.asarray(A, jnp.bfloat16))          # bf16 -> fed to the MXU
        bias_rows.append(brow)

    Ls = []
    for name, wi in zip(("lat1", "lat2", "lat3"), lat_w):
        L, brow = _fold_conv1x1(*params[name], wi)
        # Pad lateral output columns up to a full 128-lane width -> lane-dense stores.
        ncols = -(-L.shape[1] // _LANE) * _LANE
        Lp = np.zeros((L.shape[0], ncols), np.float32)
        Lp[:, :L.shape[1]] = L
        brp = np.zeros((ncols,), np.float32)
        brp[:brow.size] = brow
        Ls.append(jnp.asarray(Lp, jnp.bfloat16))
        bias_rows.append(brp)

    # Bias table: one 128-lane f32 row per segment (4 conv + 3 lateral), padded to 8 rows.
    bias = np.zeros((8, _LANE), np.float32)
    for k, r in enumerate(bias_rows):
        bias[k, :r.size] = r

    return {"A": As, "L": Ls, "bias": jnp.asarray(bias, jnp.float32)}


# ----------------------------------------------------------------------------
# The fused Pallas kernel (one grid step == one camera).
# ----------------------------------------------------------------------------
def _make_kernel(H, W):
    Cs = (3,) + STAGE_CH
    Hs = (H, H // 2, H // 4, H // 8)          # per-stage input heights
    Ws = (W, W // 2, W // 4, W // 8)          # per-stage input widths

    def kernel(x_ref, a0, a1, a2, a3, l1, l2, l3, bias_ref,
               o1_ref, o2_ref, o3_ref, s0, s1, s2):
        a_refs = (a0, a1, a2, a3)
        srcs = (x_ref, s0, s1, s2)            # x_ref already holds a zero top-pad row
        dsts = (s0, s1, s2, None)
        lats = (None, (l1, o1_ref), (l2, o2_ref), (l3, o3_ref))

        # Row 0 of every activation buffer is the conv's zero top-pad row.
        for s in (s0, s1, s2):
            s[pl.ds(0, 1), :] = jnp.zeros((1, s.shape[1]), s.dtype)

        for st in range(4):
            h_in, w_in = Hs[st], Ws[st]
            cin, cout = Cs[st], Cs[st + 1]
            ho, wo = h_in // 2, w_in // 2
            n_out = wo * cout
            src, dst, lat = srcs[st], dsts[st], lats[st]

            # Batched conv: one MXU matmul per 3x3 row-tap, M = ho output rows.
            acc = bias_ref[pl.ds(st, 1), pl.ds(0, n_out)]               # (1, n_out) f32
            for di in range(3):
                # Tap di of output row io reads (pad-shifted) input row 2*io + di.
                lhs = src[pl.ds(di, ho, stride=2), :].astype(jnp.bfloat16)  # (ho, w_in*cin)
                acc = acc + jnp.dot(lhs, a_refs[st][di],
                                    preferred_element_type=jnp.float32)
            y = jnp.maximum(acc, 0.0)                                   # bias + ReLU in f32

            if dst is not None:
                dst[pl.ds(1, ho), :] = y                                # rows 1..ho (row 0 = pad)
            if lat is not None:                                         # fused FPN lateral
                lref, oref = lat
                p = jnp.dot(y.astype(jnp.bfloat16), lref[...],
                            preferred_element_type=jnp.float32)
                p = p + bias_ref[pl.ds(3 + st, 1), :]
                oref[0] = p                                             # lane-dense (ho,128) store

    return kernel


# ----------------------------------------------------------------------------
# Sparse4DBackbone.forward  ==  extract_feat(img)[0]
# ----------------------------------------------------------------------------
def sparse4d_backbone_forward(img, packed):
    B, N, C, H, W = img.shape
    assert C == 3 and H % 16 == 0 and W % 16 == 0
    E = EMBED_DIMS
    BN = B * N

    # NCHW per camera -> rows of (W*C) lanes with channels interleaved per pixel,
    # plus one zero pad row on top so every conv row-tap is a uniform stride-2 load.
    x = jnp.transpose(img.reshape(BN, C, H, W), (0, 2, 3, 1)).reshape(BN, H, W * C)
    x = jnp.pad(x, ((0, 0), (1, 0), (0, 0))).astype(jnp.float32)

    A0, A1, A2, A3 = packed["A"]
    L1, L2, L3 = packed["L"]
    bias = packed["bias"]

    h1, h2, h3 = H // 4, H // 8, H // 16
    w1, w2, w3 = W // 4, W // 8, W // 16

    def resident(arr):
        # TODO(synk): pipeline_mode=pl.Buffered(1) to single-buffer constant-index
        #             weights (matters inside v7x's 64 MiB VMEM at production sizes).
        nd = arr.ndim
        return pl.BlockSpec(arr.shape, lambda b, _nd=nd: (0,) * _nd)

    out_shapes = (
        jax.ShapeDtypeStruct((BN, h1, _LANE), jnp.float32),   # level 0 rows (lane-dense)
        jax.ShapeDtypeStruct((BN, h2, _LANE), jnp.float32),   # level 1 rows (padded lanes)
        jax.ShapeDtypeStruct((BN, h3, _LANE), jnp.float32),   # level 2 rows (padded lanes)
    )
    out_specs = (
        pl.BlockSpec((1, h1, _LANE), lambda b: (b, 0, 0)),
        pl.BlockSpec((1, h2, _LANE), lambda b: (b, 0, 0)),
        pl.BlockSpec((1, h3, _LANE), lambda b: (b, 0, 0)),
    )

    p1, p2, p3 = pl.pallas_call(
        _make_kernel(H, W),
        out_shape=out_shapes,
        grid=(BN,),
        in_specs=[
            pl.BlockSpec((pl.Squeezed(), H + 1, W * C), lambda b: (b, 0, 0)),
            resident(A0), resident(A1), resident(A2), resident(A3),
            resident(L1), resident(L2), resident(L3),
            resident(bias),
        ],
        out_specs=out_specs,
        scratch_shapes=[
            pltpu.VMEM((H // 2 + 1, (W // 2) * STAGE_CH[0]), jnp.float32),  # stem out (+pad row)
            pltpu.VMEM((H // 4 + 1, (W // 4) * STAGE_CH[1]), jnp.float32),  # c1
            pltpu.VMEM((H // 8 + 1, (W // 8) * STAGE_CH[2]), jnp.float32),  # c2
        ],
        compiler_params=pltpu.CompilerParams(
            dimension_semantics=("parallel",)),               # cameras across cores
    )(x, A0, A1, A2, A3, L1, L2, L3, bias)

    # Layout plumbing only: drop lane padding, flatten tokens, concat levels.
    f1 = p1.reshape(BN, h1 * w1, E)
    f2 = p2[:, :, : w2 * E].reshape(BN, h2 * w2, E)
    f3 = p3[:, :, : w3 * E].reshape(BN, h3 * w3, E)
    feature = jnp.concatenate([f1, f2, f3], axis=1)
    return feature.reshape(B, N, -1, E)


# ----------------------------------------------------------------------------
# Plain-XLA reference (mirrors the kernel's bf16 weight/activation rounding).
# ----------------------------------------------------------------------------
def _reference_forward(img, params, embed_dims=EMBED_DIMS):
    B, N, C, H, W = img.shape
    x = img.reshape(B * N, C, H, W)

    def conv(x, w, b, stride, pad, relu):
        xb = x.astype(jnp.bfloat16).astype(jnp.float32)
        wb = w.astype(jnp.bfloat16).astype(jnp.float32)
        y = jax.lax.conv_general_dilated(
            xb, wb, (stride, stride), ((pad, pad), (pad, pad)),
            dimension_numbers=("NCHW", "OIHW", "NCHW"),
            precision=jax.lax.Precision.HIGHEST)
        y = y + b.reshape(1, -1, 1, 1)
        return jnp.maximum(y, 0.0) if relu else y

    c0 = conv(x, *params["stem"], 2, 1, True)
    c1 = conv(c0, *params["stage1"], 2, 1, True)
    c2 = conv(c1, *params["stage2"], 2, 1, True)
    c3 = conv(c2, *params["stage3"], 2, 1, True)
    p1 = conv(c1, *params["lat1"], 1, 0, False)
    p2 = conv(c2, *params["lat2"], 1, 0, False)
    p3 = conv(c3, *params["lat3"], 1, 0, False)

    feats = []
    for p in (p1, p2, p3):
        BN, E, h, w = p.shape
        feats.append(jnp.transpose(p, (0, 2, 3, 1)).reshape(B, N, h * w, E))
    return jnp.concatenate(feats, axis=2)


if __name__ == "__main__":
    key = jax.random.PRNGKey(0)
    pkey, ikey = jax.random.split(key)

    params = init_params(pkey)

    # Small multi-camera batch: (B=1, N_cams=2, 3, 32, 32)
    img = jax.random.normal(ikey, (1, 2, 3, 32, 32), jnp.float32)

    packed = pack_params(params, H=32, W=32)

    fwd = jax.jit(lambda im: sparse4d_backbone_forward(im, packed))
    feature = jax.block_until_ready(fwd(img))

    # Levels: 8x8, 4x4, 2x2 -> 64 + 16 + 4 = 84 tokens per camera.
    assert feature.shape == (1, 2, 84, EMBED_DIMS), feature.shape
    assert feature.dtype == jnp.float32
    assert bool(jnp.all(jnp.isfinite(feature)))

    # Validate against the XLA reference (same bf16 rounding of weights/activations).
    ref = _reference_forward(img, params)
    err = float(jnp.max(jnp.abs(feature - ref)))
    assert err < 2e-2, f"max abs error vs reference: {err}"

    print("KERNEL_OK")
</pallas_src>

<mosaic_0001>
module attributes {stable_mosaic.version = 11 : i64} {
  func.func @kernel(%arg0: i32, %arg1: memref<1x33x96xf32, #tpu.memory_space<vmem>>, %arg2: memref<3x96x128xbf16, #tpu.memory_space<vmem>>, %arg3: memref<3x128x128xbf16, #tpu.memory_space<vmem>>, %arg4: memref<3x128x128xbf16, #tpu.memory_space<vmem>>, %arg5: memref<3x128x64xbf16, #tpu.memory_space<vmem>>, %arg6: memref<128x128xbf16, #tpu.memory_space<vmem>>, %arg7: memref<128x128xbf16, #tpu.memory_space<vmem>>, %arg8: memref<64x128xbf16, #tpu.memory_space<vmem>>, %arg9: memref<8x128xf32, #tpu.memory_space<vmem>>, %arg10: memref<1x8x128xf32, #tpu.memory_space<vmem>>, %arg11: memref<1x4x128xf32, #tpu.memory_space<vmem>>, %arg12: memref<1x2x128xf32, #tpu.memory_space<vmem>>, %arg13: memref<17x128xf32, #tpu.memory_space<vmem>>, %arg14: memref<9x128xf32, #tpu.memory_space<vmem>>, %arg15: memref<5x128xf32, #tpu.memory_space<vmem>>) attributes {dimension_semantics = [#tpu.dimension_semantics<parallel>], iteration_bounds = array<i64: 2>, scalar_prefetch = 0 : i64, scratch_operands = 3 : i64, tpu.core_type = #tpu.core_type<tc>, window_params = [{transform_indices = @transform_0, window_bounds = array<i64: 1, 33, 96>}, {pipeline_mode = #tpu.pipeline_mode<synchronous>, transform_indices = @transform_1, window_bounds = array<i64: 3, 96, 128>}, {pipeline_mode = #tpu.pipeline_mode<synchronous>, transform_indices = @transform_2, window_bounds = array<i64: 3, 128, 128>}, {pipeline_mode = #tpu.pipeline_mode<synchronous>, transform_indices = @transform_3, window_bounds = array<i64: 3, 128, 128>}, {pipeline_mode = #tpu.pipeline_mode<synchronous>, transform_indices = @transform_4, window_bounds = array<i64: 3, 128, 64>}, {pipeline_mode = #tpu.pipeline_mode<synchronous>, transform_indices = @transform_5, window_bounds = array<i64: 128, 128>}, {pipeline_mode = #tpu.pipeline_mode<synchronous>, transform_indices = @transform_6, window_bounds = array<i64: 128, 128>}, {pipeline_mode = #tpu.pipeline_mode<synchronous>, transform_indices = @transform_7, window_bounds = array<i64: 64, 128>}, {pipeline_mode = #tpu.pipeline_mode<synchronous>, transform_indices = @transform_8, window_bounds = array<i64: 8, 128>}, {transform_indices = @transform_9, window_bounds = array<i64: 1, 8, 128>}, {transform_indices = @transform_10, window_bounds = array<i64: 1, 4, 128>}, {transform_indices = @transform_11, window_bounds = array<i64: 1, 2, 128>}]} {
    %cst = arith.constant 0.000000e+00 : f32
    %0 = vector.broadcast %cst : f32 to vector<1x128xf32>
    %c0 = arith.constant 0 : index
    %c0_0 = arith.constant 0 : index
    %1 = vector.load %arg13[%c0, %c0_0] : memref<17x128xf32, #tpu.memory_space<vmem>>, vector<1x128xf32>
    tpu.vector_store %arg13[%c0, %c0_0], %0 {strides = array<i32>} : memref<17x128xf32, #tpu.memory_space<vmem>>, vector<1x128xf32>,
    %cst_1 = arith.constant 0.000000e+00 : f32
    %2 = vector.broadcast %cst_1 : f32 to vector<1x128xf32>
    %c0_2 = arith.constant 0 : index
    %c0_3 = arith.constant 0 : index
    %3 = vector.load %arg14[%c0_2, %c0_3] : memref<9x128xf32, #tpu.memory_space<vmem>>, vector<1x128xf32>
    tpu.vector_store %arg14[%c0_2, %c0_3], %2 {strides = array<i32>} : memref<9x128xf32, #tpu.memory_space<vmem>>, vector<1x128xf32>,
    %cst_4 = arith.constant 0.000000e+00 : f32
    %4 = vector.broadcast %cst_4 : f32 to vector<1x128xf32>
    %c0_5 = arith.constant 0 : index
    %c0_6 = arith.constant 0 : index
    %5 = vector.load %arg15[%c0_5, %c0_6] : memref<5x128xf32, #tpu.memory_space<vmem>>, vector<1x128xf32>
    tpu.vector_store %arg15[%c0_5, %c0_6], %4 {strides = array<i32>} : memref<5x128xf32, #tpu.memory_space<vmem>>, vector<1x128xf32>,
    %c0_7 = arith.constant 0 : index
    %c0_8 = arith.constant 0 : index
    %6 = vector.load %arg9[%c0_7, %c0_8] : memref<8x128xf32, #tpu.memory_space<vmem>>, vector<1x128xf32>
    %c0_9 = arith.constant 0 : index
    %c0_10 = arith.constant 0 : index
    %c0_11 = arith.constant 0 : index
    %7 = tpu.strided_load %arg1[%c0_9, %c0_10, %c0_11] {strides = array<i32: 1, 2, 1>} : memref<1x33x96xf32, #tpu.memory_space<vmem>>, vector<1x16x96xf32>
    %8 = vector.shape_cast %7 : vector<1x16x96xf32> to vector<16x96xf32>
    %9 = arith.truncf %8 : vector<16x96xf32> to vector<16x96xbf16>
    %c0_12 = arith.constant 0 : index
    %c0_13 = arith.constant 0 : index
    %c0_14 = arith.constant 0 : index
    %10 = vector.load %arg2[%c0_12, %c0_13, %c0_14] : memref<3x96x128xbf16, #tpu.memory_space<vmem>>, vector<1x96x128xbf16>
    %11 = vector.shape_cast %10 : vector<1x96x128xbf16> to vector<96x128xbf16>
    %cst_15 = arith.constant dense<0.000000e+00> : vector<16x128xf32>
    %12 = tpu.matmul %9, %11, %cst_15 {dimension_numbers = #tpu.dot_dimension_numbers<[1], [0], [0], [1], [0, 0, 1, 1], [], []>} : vector<16x96xbf16>, vector<96x128xbf16>, vector<16x128xf32> -> vector<16x128xf32>
    %13 = vector.broadcast %6 : vector<1x128xf32> to vector<16x128xf32>
    %14 = arith.addf %13, %12 : vector<16x128xf32>
    %c0_16 = arith.constant 0 : index
    %c1 = arith.constant 1 : index
    %c0_17 = arith.constant 0 : index
    %15 = tpu.strided_load %arg1[%c0_16, %c1, %c0_17] {strides = array<i32: 1, 2, 1>} : memref<1x33x96xf32, #tpu.memory_space<vmem>>, vector<1x16x96xf32>
    %16 = vector.shape_cast %15 : vector<1x16x96xf32> to vector<16x96xf32>
    %17 = arith.truncf %16 : vector<16x96xf32> to vector<16x96xbf16>
    %c1_18 = arith.constant 1 : index
    %c0_19 = arith.constant 0 : index
    %c0_20 = arith.constant 0 : index
    %18 = vector.load %arg2[%c1_18, %c0_19, %c0_20] : memref<3x96x128xbf16, #tpu.memory_space<vmem>>, vector<1x96x128xbf16>
    %19 = vector.shape_cast %18 : vector<1x96x128xbf16> to vector<96x128xbf16>
    %cst_21 = arith.constant dense<0.000000e+00> : vector<16x128xf32>
    %20 = tpu.matmul %17, %19, %cst_21 {dimension_numbers = #tpu.dot_dimension_numbers<[1], [0], [0], [1], [0, 0, 1, 1], [], []>} : vector<16x96xbf16>, vector<96x128xbf16>, vector<16x128xf32> -> vector<16x128xf32>
    %21 = arith.addf %14, %20 : vector<16x128xf32>
    %c0_22 = arith.constant 0 : index
    %c2 = arith.constant 2 : index
    %c0_23 = arith.constant 0 : index
    %22 = tpu.strided_load %arg1[%c0_22, %c2, %c0_23] {strides = array<i32: 1, 2, 1>} : memref<1x33x96xf32, #tpu.memory_space<vmem>>, vector<1x16x96xf32>
    %23 = vector.shape_cast %22 : vector<1x16x96xf32> to vector<16x96xf32>
    %24 = arith.truncf %23 : vector<16x96xf32> to vector<16x96xbf16>
    %c2_24 = arith.constant 2 : index
    %c0_25 = arith.constant 0 : index
    %c0_26 = arith.constant 0 : index
    %25 = vector.load %arg2[%c2_24, %c0_25, %c0_26] : memref<3x96x128xbf16, #tpu.memory_space<vmem>>, vector<1x96x128xbf16>
    %26 = vector.shape_cast %25 : vector<1x96x128xbf16> to vector<96x128xbf16>
    %cst_27 = arith.constant dense<0.000000e+00> : vector<16x128xf32>
    %27 = tpu.matmul %24, %26, %cst_27 {dimension_numbers = #tpu.dot_dimension_numbers<[1], [0], [0], [1], [0, 0, 1, 1], [], []>} : vector<16x96xbf16>, vector<96x128xbf16>, vector<16x128xf32> -> vector<16x128xf32>
    %28 = arith.addf %21, %27 : vector<16x128xf32>
    %cst_28 = arith.constant 0.000000e+00 : f32
    %29 = vector.broadcast %cst_28 : f32 to vector<16x128xf32>
    %30 = arith.maximumf %28, %29 : vector<16x128xf32>
    %c1_29 = arith.constant 1 : index
    %c0_30 = arith.constant 0 : index
    %31 = vector.load %arg13[%c1_29, %c0_30] : memref<17x128xf32, #tpu.memory_space<vmem>>, vector<16x128xf32>
    tpu.vector_store %arg13[%c1_29, %c0_30], %30 {strides = array<i32>} : memref<17x128xf32, #tpu.memory_space<vmem>>, vector<16x128xf32>,
    %c1_31 = arith.constant 1 : index
    %c0_32 = arith.constant 0 : index
    %32 = vector.load %arg9[%c1_31, %c0_32] : memref<8x128xf32, #tpu.memory_space<vmem>>, vector<1x128xf32>
    %c0_33 = arith.constant 0 : index
    %c0_34 = arith.constant 0 : index
    %33 = tpu.strided_load %arg13[%c0_33, %c0_34] {strides = array<i32: 2, 1>} : memref<17x128xf32, #tpu.memory_space<vmem>>, vector<8x128xf32>
    %34 = arith.truncf %33 : vector<8x128xf32> to vector<8x128xbf16>
    %c0_35 = arith.constant 0 : index
    %c0_36 = arith.constant 0 : index
    %c0_37 = arith.constant 0 : index
    %35 = vector.load %arg3[%c0_35, %c0_36, %c0_37] : memref<3x128x128xbf16, #tpu.memory_space<vmem>>, vector<1x128x128xbf16>
    %36 = vector.shape_cast %35 : vector<1x128x128xbf16> to vector<128x128xbf16>
    %cst_38 = arith.constant dense<0.000000e+00> : vector<8x128xf32>
    %37 = tpu.matmul %34, %36, %cst_38 {dimension_numbers = #tpu.dot_dimension_numbers<[1], [0], [0], [1], [0, 0, 1, 1], [], []>} : vector<8x128xbf16>, vector<128x128xbf16>, vector<8x128xf32> -> vector<8x128xf32>
    %38 = vector.broadcast %32 : vector<1x128xf32> to vector<8x128xf32>
    %39 = arith.addf %38, %37 : vector<8x128xf32>
    %c1_39 = arith.constant 1 : index
    %c0_40 = arith.constant 0 : index
    %40 = tpu.strided_load %arg13[%c1_39, %c0_40] {strides = array<i32: 2, 1>} : memref<17x128xf32, #tpu.memory_space<vmem>>, vector<8x128xf32>
    %41 = arith.truncf %40 : vector<8x128xf32> to vector<8x128xbf16>
    %c1_41 = arith.constant 1 : index
    %c0_42 = arith.constant 0 : index
    %c0_43 = arith.constant 0 : index
    %42 = vector.load %arg3[%c1_41, %c0_42, %c0_43] : memref<3x128x128xbf16, #tpu.memory_space<vmem>>, vector<1x128x128xbf16>
    %43 = vector.shape_cast %42 : vector<1x128x128xbf16> to vector<128x128xbf16>
    %cst_44 = arith.constant dense<0.000000e+00> : vector<8x128xf32>
    %44 = tpu.matmul %41, %43, %cst_44 {dimension_numbers = #tpu.dot_dimension_numbers<[1], [0], [0], [1], [0, 0, 1, 1], [], []>} : vector<8x128xbf16>, vector<128x128xbf16>, vector<8x128xf32> -> vector<8x128xf32>
    %45 = arith.addf %39, %44 : vector<8x128xf32>
    %c2_45 = arith.constant 2 : index
    %c0_46 = arith.constant 0 : index
    %46 = tpu.strided_load %arg13[%c2_45, %c0_46] {strides = array<i32: 2, 1>} : memref<17x128xf32, #tpu.memory_space<vmem>>, vector<8x128xf32>
    %47 = arith.truncf %46 : vector<8x128xf32> to vector<8x128xbf16>
    %c2_47 = arith.constant 2 : index
    %c0_48 = arith.constant 0 : index
    %c0_49 = arith.constant 0 : index
    %48 = vector.load %arg3[%c2_47, %c0_48, %c0_49] : memref<3x128x128xbf16, #tpu.memory_space<vmem>>, vector<1x128x128xbf16>
    %49 = vector.shape_cast %48 : vector<1x128x128xbf16> to vector<128x128xbf16>
    %cst_50 = arith.constant dense<0.000000e+00> : vector<8x128xf32>
    %50 = tpu.matmul %47, %49, %cst_50 {dimension_numbers = #tpu.dot_dimension_numbers<[1], [0], [0], [1], [0, 0, 1, 1], [], []>} : vector<8x128xbf16>, vector<128x128xbf16>, vector<8x128xf32> -> vector<8x128xf32>
    %51 = arith.addf %45, %50 : vector<8x128xf32>
    %cst_51 = arith.constant 0.000000e+00 : f32
    %52 = vector.broadcast %cst_51 : f32 to vector<8x128xf32>
    %53 = arith.maximumf %51, %52 : vector<8x128xf32>
    %c1_52 = arith.constant 1 : index
    %c0_53 = arith.constant 0 : index
    %54 = vector.load %arg14[%c1_52, %c0_53] : memref<9x128xf32, #tpu.memory_space<vmem>>, vector<8x128xf32>
    tpu.vector_store %arg14[%c1_52, %c0_53], %53 {strides = array<i32>} : memref<9x128xf32, #tpu.memory_space<vmem>>, vector<8x128xf32>,
    %55 = arith.truncf %53 : vector<8x128xf32> to vector<8x128xbf16>
    %c0_54 = arith.constant 0 : index
    %c0_55 = arith.constant 0 : index
    %56 = vector.load %arg6[%c0_54, %c0_55] : memref<128x128xbf16, #tpu.memory_space<vmem>>, vector<128x128xbf16>
    %cst_56 = arith.constant dense<0.000000e+00> : vector<8x128xf32>
    %57 = tpu.matmul %55, %56, %cst_56 {dimension_numbers = #tpu.dot_dimension_numbers<[1], [0], [0], [1], [0, 0, 1, 1], [], []>} : vector<8x128xbf16>, vector<128x128xbf16>, vector<8x128xf32> -> vector<8x128xf32>
    %c4 = arith.constant 4 : index
    %c0_57 = arith.constant 0 : index
    %58 = vector.load %arg9[%c4, %c0_57] : memref<8x128xf32, #tpu.memory_space<vmem>>, vector<1x128xf32>
    %59 = vector.broadcast %58 : vector<1x128xf32> to vector<8x128xf32>
    %60 = arith.addf %57, %59 : vector<8x128xf32>
    %c0_58 = arith.constant 0 : index
    %c0_59 = arith.constant 0 : index
    %c0_60 = arith.constant 0 : index
    %61 = vector.load %arg10[%c0_58, %c0_59, %c0_60] : memref<1x8x128xf32, #tpu.memory_space<vmem>>, vector<1x8x128xf32>
    %62 = vector.shape_cast %61 : vector<1x8x128xf32> to vector<8x128xf32>
    %63 = vector.shape_cast %60 : vector<8x128xf32> to vector<1x8x128xf32>
    tpu.vector_store %arg10[%c0_58, %c0_59, %c0_60], %63 {strides = array<i32>} : memref<1x8x128xf32, #tpu.memory_space<vmem>>, vector<1x8x128xf32>,
    %c2_61 = arith.constant 2 : index
    %c0_62 = arith.constant 0 : index
    %64 = vector.load %arg9[%c2_61, %c0_62] : memref<8x128xf32, #tpu.memory_space<vmem>>, vector<1x128xf32>
    %c0_63 = arith.constant 0 : index
    %c0_64 = arith.constant 0 : index
    %65 = tpu.strided_load %arg14[%c0_63, %c0_64] {strides = array<i32: 2, 1>} : memref<9x128xf32, #tpu.memory_space<vmem>>, vector<4x128xf32>
    %66 = arith.truncf %65 : vector<4x128xf32> to vector<4x128xbf16>
    %c0_65 = arith.constant 0 : index
    %c0_66 = arith.constant 0 : index
    %c0_67 = arith.constant 0 : index
    %67 = vector.load %arg4[%c0_65, %c0_66, %c0_67] : memref<3x128x128xbf16, #tpu.memory_space<vmem>>, vector<1x128x128xbf16>
    %68 = vector.shape_cast %67 : vector<1x128x128xbf16> to vector<128x128xbf16>
    %cst_68 = arith.constant dense<0.000000e+00> : vector<4x128xf32>
    %69 = tpu.matmul %66, %68, %cst_68 {dimension_numbers = #tpu.dot_dimension_numbers<[1], [0], [0], [1], [0, 0, 1, 1], [], []>} : vector<4x128xbf16>, vector<128x128xbf16>, vector<4x128xf32> -> vector<4x128xf32>
    %70 = vector.broadcast %64 : vector<1x128xf32> to vector<4x128xf32>
    %71 = arith.addf %70, %69 : vector<4x128xf32>
    %c1_69 = arith.constant 1 : index
    %c0_70 = arith.constant 0 : index
    %72 = tpu.strided_load %arg14[%c1_69, %c0_70] {strides = array<i32: 2, 1>} : memref<9x128xf32, #tpu.memory_space<vmem>>, vector<4x128xf32>
    %73 = arith.truncf %72 : vector<4x128xf32> to vector<4x128xbf16>
    %c1_71 = arith.constant 1 : index
    %c0_72 = arith.constant 0 : index
    %c0_73 = arith.constant 0 : index
    %74 = vector.load %arg4[%c1_71, %c0_72, %c0_73] : memref<3x128x128xbf16, #tpu.memory_space<vmem>>, vector<1x128x128xbf16>
    %75 = vector.shape_cast %74 : vector<1x128x128xbf16> to vector<128x128xbf16>
    %cst_74 = arith.constant dense<0.000000e+00> : vector<4x128xf32>
    %76 = tpu.matmul %73, %75, %cst_74 {dimension_numbers = #tpu.dot_dimension_numbers<[1], [0], [0], [1], [0, 0, 1, 1], [], []>} : vector<4x128xbf16>, vector<128x128xbf16>, vector<4x128xf32> -> vector<4x128xf32>
    %77 = arith.addf %71, %76 : vector<4x128xf32>
    %c2_75 = arith.constant 2 : index
    %c0_76 = arith.constant 0 : index
    %78 = tpu.strided_load %arg14[%c2_75, %c0_76] {strides = array<i32: 2, 1>} : memref<9x128xf32, #tpu.memory_space<vmem>>, vector<4x128xf32>
    %79 = arith.truncf %78 : vector<4x128xf32> to vector<4x128xbf16>
    %c2_77 = arith.constant 2 : index
    %c0_78 = arith.constant 0 : index
    %c0_79 = arith.constant 0 : index
    %80 = vector.load %arg4[%c2_77, %c0_78, %c0_79] : memref<3x128x128xbf16, #tpu.memory_space<vmem>>, vector<1x128x128xbf16>
    %81 = vector.shape_cast %80 : vector<1x128x128xbf16> to vector<128x128xbf16>
    %cst_80 = arith.constant dense<0.000000e+00> : vector<4x128xf32>
    %82 = tpu.matmul %79, %81, %cst_80 {dimension_numbers = #tpu.dot_dimension_numbers<[1], [0], [0], [1], [0, 0, 1, 1], [], []>} : vector<4x128xbf16>, vector<128x128xbf16>, vector<4x128xf32> -> vector<4x128xf32>
    %83 = arith.addf %77, %82 : vector<4x128xf32>
    %cst_81 = arith.constant 0.000000e+00 : f32
    %84 = vector.broadcast %cst_81 : f32 to vector<4x128xf32>
    %85 = arith.maximumf %83, %84 : vector<4x128xf32>
    %c1_82 = arith.constant 1 : index
    %c0_83 = arith.constant 0 : index
    %86 = vector.load %arg15[%c1_82, %c0_83] : memref<5x128xf32, #tpu.memory_space<vmem>>, vector<4x128xf32>
    tpu.vector_store %arg15[%c1_82, %c0_83], %85 {strides = array<i32>} : memref<5x128xf32, #tpu.memory_space<vmem>>, vector<4x128xf32>,
    %87 = arith.truncf %85 : vector<4x128xf32> to vector<4x128xbf16>
    %c0_84 = arith.constant 0 : index
    %c0_85 = arith.constant 0 : index
    %88 = vector.load %arg7[%c0_84, %c0_85] : memref<128x128xbf16, #tpu.memory_space<vmem>>, vector<128x128xbf16>
    %cst_86 = arith.constant dense<0.000000e+00> : vector<4x128xf32>
    %89 = tpu.matmul %87, %88, %cst_86 {dimension_numbers = #tpu.dot_dimension_numbers<[1], [0], [0], [1], [0, 0, 1, 1], [], []>} : vector<4x128xbf16>, vector<128x128xbf16>, vector<4x128xf32> -> vector<4x128xf32>
    %c5 = arith.constant 5 : index
    %c0_87 = arith.constant 0 : index
    %90 = vector.load %arg9[%c5, %c0_87] : memref<8x128xf32, #tpu.memory_space<vmem>>, vector<1x128xf32>
    %91 = vector.broadcast %90 : vector<1x128xf32> to vector<4x128xf32>
    %92 = arith.addf %89, %91 : vector<4x128xf32>
    %c0_88 = arith.constant 0 : index
    %c0_89 = arith.constant 0 : index
    %c0_90 = arith.constant 0 : index
    %93 = vector.load %arg11[%c0_88, %c0_89, %c0_90] : memref<1x4x128xf32, #tpu.memory_space<vmem>>, vector<1x4x128xf32>
    %94 = vector.shape_cast %93 : vector<1x4x128xf32> to vector<4x128xf32>
    %95 = vector.shape_cast %92 : vector<4x128xf32> to vector<1x4x128xf32>
    tpu.vector_store %arg11[%c0_88, %c0_89, %c0_90], %95 {strides = array<i32>} : memref<1x4x128xf32, #tpu.memory_space<vmem>>, vector<1x4x128xf32>,
    %c3 = arith.constant 3 : index
    %c0_91 = arith.constant 0 : index
    %96 = vector.load %arg9[%c3, %c0_91] : memref<8x128xf32, #tpu.memory_space<vmem>>, vector<1x64xf32>
    %c0_92 = arith.constant 0 : index
    %c0_93 = arith.constant 0 : index
    %97 = tpu.strided_load %arg15[%c0_92, %c0_93] {strides = array<i32: 2, 1>} : memref<5x128xf32, #tpu.memory_space<vmem>>, vector<2x128xf32>
    %98 = arith.truncf %97 : vector<2x128xf32> to vector<2x128xbf16>
    %c0_94 = arith.constant 0 : index
    %c0_95 = arith.constant 0 : index
    %c0_96 = arith.constant 0 : index
    %99 = vector.load %arg5[%c0_94, %c0_95, %c0_96] : memref<3x128x64xbf16, #tpu.memory_space<vmem>>, vector<1x128x64xbf16>
    %100 = vector.shape_cast %99 : vector<1x128x64xbf16> to vector<128x64xbf16>
    %cst_97 = arith.constant dense<0.000000e+00> : vector<2x64xf32>
    %101 = tpu.matmul %98, %100, %cst_97 {dimension_numbers = #tpu.dot_dimension_numbers<[1], [0], [0], [1], [0, 0, 1, 1], [], []>} : vector<2x128xbf16>, vector<128x64xbf16>, vector<2x64xf32> -> vector<2x64xf32>
    %102 = vector.broadcast %96 : vector<1x64xf32> to vector<2x64xf32>
    %103 = arith.addf %102, %101 : vector<2x64xf32>
    %c1_98 = arith.constant 1 : index
    %c0_99 = arith.constant 0 : index
    %104 = tpu.strided_load %arg15[%c1_98, %c0_99] {strides = array<i32: 2, 1>} : memref<5x128xf32, #tpu.memory_space<vmem>>, vector<2x128xf32>
    %105 = arith.truncf %104 : vector<2x128xf32> to vector<2x128xbf16>
    %c1_100 = arith.constant 1 : index
    %c0_101 = arith.constant 0 : index
    %c0_102 = arith.constant 0 : index
    %106 = vector.load %arg5[%c1_100, %c0_101, %c0_102] : memref<3x128x64xbf16, #tpu.memory_space<vmem>>, vector<1x128x64xbf16>
    %107 = vector.shape_cast %106 : vector<1x128x64xbf16> to vector<128x64xbf16>
    %cst_103 = arith.constant dense<0.000000e+00> : vector<2x64xf32>
    %108 = tpu.matmul %105, %107, %cst_103 {dimension_numbers = #tpu.dot_dimension_numbers<[1], [0], [0], [1], [0, 0, 1, 1], [], []>} : vector<2x128xbf16>, vector<128x64xbf16>, vector<2x64xf32> -> vector<2x64xf32>
    %109 = arith.addf %103, %108 : vector<2x64xf32>
    %c2_104 = arith.constant 2 : index
    %c0_105 = arith.constant 0 : index
    %110 = tpu.strided_load %arg15[%c2_104, %c0_105] {strides = array<i32: 2, 1>} : memref<5x128xf32, #tpu.memory_space<vmem>>, vector<2x128xf32>
    %111 = arith.truncf %110 : vector<2x128xf32> to vector<2x128xbf16>
    %c2_106 = arith.constant 2 : index
    %c0_107 = arith.constant 0 : index
    %c0_108 = arith.constant 0 : index
    %112 = vector.load %arg5[%c2_106, %c0_107, %c0_108] : memref<3x128x64xbf16, #tpu.memory_space<vmem>>, vector<1x128x64xbf16>
    %113 = vector.shape_cast %112 : vector<1x128x64xbf16> to vector<128x64xbf16>
    %cst_109 = arith.constant dense<0.000000e+00> : vector<2x64xf32>
    %114 = tpu.matmul %111, %113, %cst_109 {dimension_numbers = #tpu.dot_dimension_numbers<[1], [0], [0], [1], [0, 0, 1, 1], [], []>} : vector<2x128xbf16>, vector<128x64xbf16>, vector<2x64xf32> -> vector<2x64xf32>
    %115 = arith.addf %109, %114 : vector<2x64xf32>
    %cst_110 = arith.constant 0.000000e+00 : f32
    %116 = vector.broadcast %cst_110 : f32 to vector<2x64xf32>
    %117 = arith.maximumf %115, %116 : vector<2x64xf32>
    %118 = arith.truncf %117 : vector<2x64xf32> to vector<2x64xbf16>
    %c0_111 = arith.constant 0 : index
    %c0_112 = arith.constant 0 : index
    %119 = vector.load %arg8[%c0_111, %c0_112] : memref<64x128xbf16, #tpu.memory_space<vmem>>, vector<64x128xbf16>
    %cst_113 = arith.constant dense<0.000000e+00> : vector<2x128xf32>
    %120 = tpu.matmul %118, %119, %cst_113 {dimension_numbers = #tpu.dot_dimension_numbers<[1], [0], [0], [1], [0, 0, 1, 1], [], []>} : vector<2x64xbf16>, vector<64x128xbf16>, vector<2x128xf32> -> vector<2x128xf32>
    %c6 = arith.constant 6 : index
    %c0_114 = arith.constant 0 : index
    %121 = vector.load %arg9[%c6, %c0_114] : memref<8x128xf32, #tpu.memory_space<vmem>>, vector<1x128xf32>
    %122 = vector.broadcast %121 : vector<1x128xf32> to vector<2x128xf32>
    %123 = arith.addf %120, %122 : vector<2x128xf32>
    %c0_115 = arith.constant 0 : index
    %c0_116 = arith.constant 0 : index
    %c0_117 = arith.constant 0 : index
    %124 = vector.load %arg12[%c0_115, %c0_116, %c0_117] : memref<1x2x128xf32, #tpu.memory_space<vmem>>, vector<1x2x128xf32>
    %125 = vector.shape_cast %124 : vector<1x2x128xf32> to vector<2x128xf32>
    %126 = vector.shape_cast %123 : vector<2x128xf32> to vector<1x2x128xf32>
    tpu.vector_store %arg12[%c0_115, %c0_116, %c0_117], %126 {strides = array<i32>} : memref<1x2x128xf32, #tpu.memory_space<vmem>>, vector<1x2x128xf32>,
    return
  }
  func.func @transform_0(%arg0: i32) -> (i32, i32, i32) {
    %c0_i32 = arith.constant 0 : i32
    %c0_i32_0 = arith.constant 0 : i32
    %c0_i32_1 = arith.constant 0 : i32
    return %arg0, %c0_i32, %c0_i32_0 : i32, i32, i32
  }
  func.func @transform_1(%arg0: i32) -> (i32, i32, i32) {
    %c0_i32 = arith.constant 0 : i32
    %c0_i32_0 = arith.constant 0 : i32
    %c0_i32_1 = arith.constant 0 : i32
    %c0_i32_2 = arith.constant 0 : i32
    return %c0_i32, %c0_i32_0, %c0_i32_1 : i32, i32, i32
  }
  func.func @transform_2(%arg0: i32) -> (i32, i32, i32) {
    %c0_i32 = arith.constant 0 : i32
    %c0_i32_0 = arith.constant 0 : i32
    %c0_i32_1 = arith.constant 0 : i32
    %c0_i32_2 = arith.constant 0 : i32
    return %c0_i32, %c0_i32_0, %c0_i32_1 : i32, i32, i32
  }
  func.func @transform_3(%arg0: i32) -> (i32, i32, i32) {
    %c0_i32 = arith.constant 0 : i32
    %c0_i32_0 = arith.constant 0 : i32
    %c0_i32_1 = arith.constant 0 : i32
    %c0_i32_2 = arith.constant 0 : i32
    return %c0_i32, %c0_i32_0, %c0_i32_1 : i32, i32, i32
  }
  func.func @transform_4(%arg0: i32) -> (i32, i32, i32) {
    %c0_i32 = arith.constant 0 : i32
    %c0_i32_0 = arith.constant 0 : i32
    %c0_i32_1 = arith.constant 0 : i32
    %c0_i32_2 = arith.constant 0 : i32
    return %c0_i32, %c0_i32_0, %c0_i32_1 : i32, i32, i32
  }
  func.func @transform_5(%arg0: i32) -> (i32, i32) {
    %c0_i32 = arith.constant 0 : i32
    %c0_i32_0 = arith.constant 0 : i32
    %c0_i32_1 = arith.constant 0 : i32
    return %c0_i32, %c0_i32_0 : i32, i32
  }
  func.func @transform_6(%arg0: i32) -> (i32, i32) {
    %c0_i32 = arith.constant 0 : i32
    %c0_i32_0 = arith.constant 0 : i32
    %c0_i32_1 = arith.constant 0 : i32
    return %c0_i32, %c0_i32_0 : i32, i32
  }
  func.func @transform_7(%arg0: i32) -> (i32, i32) {
    %c0_i32 = arith.constant 0 : i32
    %c0_i32_0 = arith.constant 0 : i32
    %c0_i32_1 = arith.constant 0 : i32
    return %c0_i32, %c0_i32_0 : i32, i32
  }
  func.func @transform_8(%arg0: i32) -> (i32, i32) {
    %c0_i32 = arith.constant 0 : i32
    %c0_i32_0 = arith.constant 0 : i32
    %c0_i32_1 = arith.constant 0 : i32
    return %c0_i32, %c0_i32_0 : i32, i32
  }
  func.func @transform_9(%arg0: i32) -> (i32, i32, i32) {
    %c0_i32 = arith.constant 0 : i32
    %c0_i32_0 = arith.constant 0 : i32
    %c0_i32_1 = arith.constant 0 : i32
    return %arg0, %c0_i32, %c0_i32_0 : i32, i32, i32
  }
  func.func @transform_10(%arg0: i32) -> (i32, i32, i32) {
    %c0_i32 = arith.constant 0 : i32
    %c0_i32_0 = arith.constant 0 : i32
    %c0_i32_1 = arith.constant 0 : i32
    return %arg0, %c0_i32, %c0_i32_0 : i32, i32, i32
  }
  func.func @transform_11(%arg0: i32) -> (i32, i32, i32) {
    %c0_i32 = arith.constant 0 : i32
    %c0_i32_0 = arith.constant 0 : i32
    %c0_i32_1 = arith.constant 0 : i32
    return %arg0, %c0_i32, %c0_i32_0 : i32, i32, i32
  }
}

</mosaic_0001>

<bundles_post_ra>
// kernel: _lambda_.1
= control target key start
LH: loop header
LB: loop body
LE: loop exit
PB: predicated region body
PF: predicated region fallthrough
CT: control target
= control target key end

     0   :  { %17 = vsyncpa [#allocation6], 0  ;;  %s3733_s0 = inlined_call_operand.vmem [shape: f32[2,33,96], index: 0, kind: input, shape index: {}]   ;;  %s3734_s1 = inlined_call_operand.vmem [shape: bf16[3,96,128], index: 1, kind: input, shape index: {}]   ;;  %s3735_s2 = inlined_call_operand.vmem [shape: bf16[3,128,128], index: 2, kind: input, shape index: {}]   ;;  %s3736_s3 = inlined_call_operand.vmem [shape: bf16[3,128,128], index: 3, kind: input, shape index: {}]   ;;  %s3737_s4 = inlined_call_operand.vmem [shape: bf16[3,128,64], index: 4, kind: input, shape index: {}]   ;;  %s3738_s5 = inlined_call_operand.hbm [shape: bf16[128,128], index: 5, kind: input, shape index: {}]   ;;  %s3739_s6 = inlined_call_operand.vmem [shape: bf16[128,128], index: 6, kind: input, shape index: {}]   ;;  %s3740_s7 = inlined_call_operand.vmem [shape: bf16[64,128], index: 7, kind: input, shape index: {}]   ;;  %s3741_s8 = inlined_call_operand.hbm [shape: f32[8,128], index: 8, kind: input, shape index: {}]   ;;  %s3742_s9 = inlined_call_operand.vmem [shape: f32[2,8,128], index: 9, kind: output, shape index: {0}]   ;;  %s3743_s10 = inlined_call_operand.vmem [shape: f32[2,4,128], index: 10, kind: output, shape index: {1}]   ;;  %s3744_s11 = inlined_call_operand.vmem [shape: f32[2,2,128], index: 11, kind: output, shape index: {2}]  }
   0x1   :  { %18 = vsyncpa [#allocation8], 0  ;;  %s3168_s17 = smov 0  }
   0x2 LB: > { %s3174_s18 = sadd.s32 4294967295, %s3100_s17   ;;  %p2185_p0 = scmp.ge.s32.totalorder %s3100_s17, 1  ;;  %s3100_s17 = sphi %s3168_s17, %s24_s17  }
   0x3   : > { %p301_p1 = scmp.lt.s32.totalorder %s3100_s17, 3  ;;  %s3102_s19 = smov [#allocation5]  }
   0x4   : > { %s325_s20 = sshll.u32 %s3102_s19, 4  ;;  %p3745_p3 = scmp.eq.s32.totalorder %s3174_s18, 0  ;;  %s326_s20 = int_to_ptr.vmem [resolvable:$true] %s325_s20 }
   0x5   : > { %p3178_p2 = pnand %p2185_p0, %p301_p1  ;;  %s3103_s22 = smov [#allocation7]  }
   0x6   : > { %s345_s23 = sshll.u32 %s3103_s22, 4  ;;  %s3030_s27 = scalar_lea.hbm %s3738_s5, 1024  ;;  %s3191_s23 = int_to_ptr.vmem [resolvable:$true] %s345_s23 }
   0x7   : > { %s3747_s21 = scalar_select %p3178_p2, 1, 0 }
   0x8   : > { %p2895_p4 = pneg %p3178_p2  ;;  %p3031_p6 = scmp.ne.s32.totalorder %s3738_s5, %s3030_s27 }
   0x9   : > { %p3037_p10 = scmp.lt.u32.totalorder %s3030_s27, %s3738_s5 }
   0xa   : > { %p3187_p5 = pnand %p3745_p3, %p2895_p4 }
   0xc   : > { %p3032_p7 = pneg %p3187_p5 }
   0xe   : > { %p3033_p8 = pnand %p3032_p7, %p3031_p6 }
  0x10   : > { %p3034_p9 = pneg %p3033_p8 }
  0x12   : > { %p3039_p11 = pnand %p3037_p10, %p3034_p9 }
  0x14   : > { %3042 = shalt.err (!%p3039_p11)
}
  0x15   : > { %s3043_s13 = scalar_lea.vmem %s326_s20, 1024  ;;  %p3051_p1 = scmp.lt.s32.totalorder %s326_s20, %s326_s20 }
  0x16   : > { %p3044_p12 = scmp.ne.s32.totalorder %s326_s20, %s3043_s13  ;;  %p3052_p4 = scmp.lt.s32.totalorder %s3043_s13, %s3043_s13 }
  0x18   : > { %p3046_p13 = pnand %p3044_p12, %p3032_p7  ;;  %p3053_p3 = por %p3052_p4, %p3051_p1 }
  0x1a   : > { %p3047_p0 = pneg %p3046_p13 }
  0x1c   : > { %p3054_p2 = pnand %p3053_p3, %p3047_p0 }
  0x1e   : > { %3057 = shalt.err (!%p3054_p2)
}
  0x1f   : > { %s3104_s14 = smov 64   ;;  %s3105_s15 = smov 4  }
  0x20   : > { %2898 = dma.hbm_to_vmem [thread:$0]  (!%p3187_p5), %s3738_s5, 1024, %s326_s20, [#allocation6], %s3104_s14, %s3104_s14, %s3105_s15  }
  0x21   : > { %s3058_s26 = scalar_lea.hbm %s3741_s8, 128 }
  0x22   : > { %p3059_p6 = scmp.ne.s32.totalorder %s3741_s8, %s3058_s26  ;;  %p3065_p8 = scmp.lt.u32.totalorder %s3058_s26, %s3741_s8 }
  0x24   : > { %p3061_p2 = pnand %p3059_p6, %p3032_p7 }
  0x26   : > { %p3062_p3 = pneg %p3061_p2 }
  0x28   : > { %p3067_p9 = pnand %p3065_p8, %p3062_p3 }
  0x2a   : > { %3070 = shalt.err (!%p3067_p9)
}
  0x2b   : > { %s3071_s20 = scalar_lea.vmem %s3191_s23, 128  ;;  %p3079_p13 = scmp.lt.s32.totalorder %s3191_s23, %s3191_s23 }
  0x2c   : > { %p3072_p10 = scmp.ne.s32.totalorder %s3191_s23, %s3071_s20  ;;  %p3080_p0 = scmp.lt.s32.totalorder %s3071_s20, %s3071_s20 }
  0x2e   : > { %p3074_p11 = pnand %p3072_p10, %p3032_p7  ;;  %p3081_p1 = por %p3080_p0, %p3079_p13 }
  0x30   : > { %p3075_p12 = pneg %p3074_p11 }
  0x32   : > { %p3082_p4 = pnand %p3081_p1, %p3075_p12 }
  0x34   : > { %3085 = shalt.err (!%p3082_p4)
}
  0x35   : > { %2901 = dma.hbm_to_vmem [thread:$0]  (!%p3187_p5), %s3741_s8, 128, %s3191_s23, [#allocation8]  }
  0x36   : > { %p3749_p6 = scmp.ne.s32.totalorder %s3747_s21, 0 }
  0x37   : > { %p3750_p2 = scmp.eq.s32.totalorder (!%p3749_p6), %s3174_s18, 0 }
  0x38   : > { %366 = sbr.rel (%p3749_p6) target bundleno = 1470 (0x5be), region = 56 }
  0x3f   : > { %3091 = dma.done.wait (%p3750_p2), [#allocation6], 1024   ;;  %p3751_p7 = pmov %p3750_p2 }
  0x40   : > { %p3752_p3 = pmov %p3750_p2 }
  0x41   : > { %3093 = vsyncadd (%p3751_p7), [#allocation6], 4294966272 }
  0x42   : > { %3095 = dma.done.wait (%p3752_p3), [#allocation8], 128   ;;  %p3753_p8 = pmov %p3750_p2 }
  0x43   : > { %v3106_v0 = vmov 0.0   ;;  %vm3107_vm0 = vmmov 0   ;;  %v2920_v1 = vld [vmem:[%s3734_s1] sm:$0xff]   ;;  %v2921_v2 = vld [vmem:[%s3734_s1 + $0x8] sm:$0xff]   ;;  %p417_p5 = scmp.lt.s32.totalorder %s3174_s18, 1  ;;  %v2922_v3 = vld [vmem:[%s3734_s1 + $0x10] sm:$0xff]  }
  0x44   : > { %3097 = vsyncadd (%p3753_p8), [#allocation8], 4294967168  ;;  %2569 = vmatprep.subr.bf16.mxu0 %v3106_v0  ;;  %435 = vst [vmem:[#allocation2] sm:$0x1] %v3106_v0  ;;  %2581 = vmatprep.mubr.msk.bf16.mxu0 %vm3107_vm0, %v3106_v0  ;;  %v2923_v4 = vld [vmem:[%s3734_s1 + $0x18] sm:$0xff]   ;;  %v2924_v5 = vld [vmem:[%s3734_s1 + $0x20] sm:$0xff]  }
  0x45   : > { %436 = vst [vmem:[#allocation3] sm:$0x1] %v3106_v0  ;;  %437 = vst [vmem:[#allocation4] sm:$0x1] %v3106_v0  ;;  %2617 = vmatprep.subr.bf16.mxu1 %v3106_v0  ;;  %2633 = vmatprep.mubr.msk.bf16.mxu1 %vm3107_vm0, %v3106_v0  ;;  %s3755_s18 = smov (!%p417_p5, %s3174_s18), 1  ;;  %v2925_v6 = vld [vmem:[%s3734_s1 + $0x28] sm:$0xff]  }
  0x46   : > { %2570 = vmatpush3.bf16.msra.mxu0 %v2920_v1  ;;  %s2886_s25 = smul.u32 40, %s3755_s18  ;;  %v2938_v9 = vld [vmem:[%s3735_s2] sm:$0xff]   ;;  %vm491_vm1 = vcmask 785408   ;;  %v2926_v11 = vld [vmem:[%s3734_s1 + $0x30] sm:$0xff]   ;;  %v2939_v12 = vld [vmem:[%s3735_s2 + $0x8] sm:$0xff]   ;;  %s2194_s26 = sshll.u32 %s3755_s18, 2 }
  0x47   : > { %2571 = vmatprep.subr.bf16.mxu0 %v3106_v0  ;;  %2618 = vmatpush3.bf16.msra.mxu1 %v2938_v9  ;;  %v2927_v13 = vld [vmem:[%s3734_s1 + $0x38] sm:$0xff]   ;;  %v2940_v14 = vld [vmem:[%s3735_s2 + $0x10] sm:$0xff]   ;;  %v2928_v15 = vld [vmem:[%s3734_s1 + $0x40] sm:$0xff]   ;;  %s429_s29 = scalar_lea.vmem %s3743_s10, %s2194_s26  ;;  %vm2001_vm2 = vcmask 523264   ;;  %s2195_s20 = sshll.u32 %s3755_s18, 1 }
  0x48   : > { %s3285_s30 = scalar_lea.vmem %s3733_s0, %s2886_s25  ;;  %2619 = vmatprep.subr.bf16.mxu1 %v3106_v0  ;;  %v2941_v16 = vld [vmem:[%s3735_s2 + $0x18] sm:$0xff]   ;;  %v2929_v17 = vld [vmem:[%s3734_s1 + $0x48] sm:$0xff]   ;;  %v2930_v18 = vld [vmem:[%s3734_s1 + $0x50] sm:$0xff]   ;;  %s433_s21 = scalar_lea.vmem %s3744_s11, %s2195_s20 }
  0x49   : > { %v439_v7 = vld [vmem:[%s3285_s30] ss:$2 sm:$0xff]  ;;  %v2196_v8 = vld [vmem:[%s3285_s30 + $0x10] ss:$2 sm:$0xff]  ;;  %v2205_v20 = vld [vmem:[%s3285_s30 + $0x1] ss:$2 sm:$0xff] }
  0x4a   : > { %2572 = vmatpush3.bf16.msra.mxu0 %v2921_v2  ;;  %v442_v10 = vpack.c.bf16 %v2196_v8, %v439_v7  ;;  %v2931_v19 = vld [vmem:[%s3734_s1 + $0x58] sm:$0xff]   ;;  %v2932_v22 = vld [vmem:[%s3734_s1 + $0x60] sm:$0xff]   ;;  %v2933_v24 = vld [vmem:[%s3734_s1 + $0x68] sm:$0xff]  }
  0x4b   : > { %2573 = vmatprep.subr.bf16.mxu0 %v3106_v0  ;;  %2620 = vmatpush3.bf16.msra.mxu1 %v2939_v12  ;;  %v2206_v21 = vld [vmem:[%s3285_s30 + $0x11] ss:$2 sm:$0xff]  ;;  %v2936_v27 = vld [vmem:[%s3734_s1 + $0x80] sm:$0xff]   ;;  %v2937_v28 = vld [vmem:[%s3734_s1 + $0x88] sm:$0xff]  }
  0x4c   : > { %2621 = vmatprep.subr.bf16.mxu1 %v3106_v0  ;;  %v546_v23 = vpack.c.bf16 %v2206_v21, %v2205_v20  ;;  %v2934_v25 = vld [vmem:[%s3734_s1 + $0x70] sm:$0xff]   ;;  %v2935_v26 = vld [vmem:[%s3734_s1 + $0x78] sm:$0xff]   ;;  %v2942_v32 = vld [vmem:[%s3735_s2 + $0x20] sm:$0xff]  }
  0x4d   : > { %v2226_v29 = vld [vmem:[%s3285_s30 + $0x2] ss:$2 sm:$0xff]  ;;  %v2227_v30 = vld [vmem:[%s3285_s30 + $0x12] ss:$2 sm:$0xff]  ;;  %v2255_v20 = vld [vmem:[#allocation7 + $0x1] ss:$0 sm:$0xff] }
  0x4e   : > { %2574 = vmatpush3.bf16.msra.mxu0 %v2922_v3  ;;  %v646_v31 = vpack.c.bf16 %v2227_v30, %v2226_v29  ;;  %v2943_v33 = vld [vmem:[%s3735_s2 + $0x28] sm:$0xff]   ;;  %v2944_v34 = vld [vmem:[%s3735_s2 + $0x30] sm:$0xff]   ;;  %v2945_v35 = vld [vmem:[%s3735_s2 + $0x38] sm:$0xff]   ;;  %s2193_s30 = sshll.u32 %s3755_s18, 3 }
  0x4f   : > { %2575 = vmatprep.subr.bf16.mxu0 %v3106_v0  ;;  %2622 = vmatpush3.bf16.msra.mxu1 %v2940_v14  ;;  %v2962_v36 = vld [vmem:[#allocation5] sm:$0xff]   ;;  %v2963_v37 = vld [vmem:[#allocation5 + $0x8] sm:$0xff]   ;;  %v2965_v38 = vld [vmem:[#allocation5 + $0x10] sm:$0xff]   ;;  %s425_s14 = scalar_lea.vmem %s3742_s9, %s2193_s30 }
  0x50   : > { %2623 = vmatprep.subr.bf16.mxu1 %v3106_v0  ;;  %v2967_v39 = vld [vmem:[#allocation5 + $0x18] sm:$0xff]   ;;  %v2969_v40 = vld [vmem:[#allocation5 + $0x20] sm:$0xff]   ;;  %v2971_v41 = vld [vmem:[#allocation5 + $0x28] sm:$0xff]  }
  0x51   : > { %v2204_v42 = vld [vmem:[#allocation7] ss:$0 sm:$0xff]  ;;  %v2946_v52 = vld [vmem:[%s3735_s2 + $0x40] sm:$0xff]   ;;  %v2947_v54 = vld [vmem:[%s3735_s2 + $0x48] sm:$0xff]  }
  0x52   : > { %2576 = vmatpush3.bf16.msra.mxu0 %v2923_v4  ;;  %v2948_v55 = vld [vmem:[%s3735_s2 + $0x50] sm:$0xff]   ;;  %v2949_v56 = vld [vmem:[%s3735_s2 + $0x58] sm:$0xff]   ;;  %v2950_v57 = vld [vmem:[%s3735_s2 + $0x60] sm:$0xff]  }
  0x53   : > { %2577 = vmatprep.subr.bf16.mxu0 %v3106_v0  ;;  %2624 = vmatpush3.bf16.msra.mxu1 %v2941_v16  ;;  %v2951_v58 = vld [vmem:[%s3735_s2 + $0x68] sm:$0xff]   ;;  %v2952_v59 = vld [vmem:[%s3735_s2 + $0x70] sm:$0xff]   ;;  %v2953_v60 = vld [vmem:[%s3735_s2 + $0x78] sm:$0xff]  }
  0x54   : > { %2625 = vmatprep.subr.bf16.mxu1 %v3106_v0  ;;  %v2954_v62 = vld [vmem:[%s3735_s2 + $0x80] sm:$0xff]   ;;  %v2955_v1 = vld [vmem:[%s3735_s2 + $0x88] sm:$0xff]   ;;  %v2956_v2 = vld [vmem:[%s3735_s2 + $0x90] sm:$0xff]  }
  0x55   : > { %v2957_v3 = vld [vmem:[%s3735_s2 + $0x98] sm:$0xff]   ;;  %v2958_v4 = vld [vmem:[%s3735_s2 + $0xa0] sm:$0xff]   ;;  %v2968_v12 = vld [vmem:[%s3736_s3 + $0x10] sm:$0xff]  }
  0x56   : > { %2578 = vmatpush3.bf16.msra.mxu0 %v2924_v5  ;;  %v2959_v5 = vld [vmem:[%s3735_s2 + $0xa8] sm:$0xff]   ;;  %v2961_v7 = vld [vmem:[%s3735_s2 + $0xb8] sm:$0xff]   ;;  %v2964_v9 = vld [vmem:[%s3736_s3] sm:$0xff]  }
  0x57   : > { %2579 = vmatprep.subr.bf16.mxu0 %v3106_v0  ;;  %2626 = vmatpush3.bf16.msra.mxu1 %v2942_v32  ;;  %v2972_v14 = vld [vmem:[%s3736_s3 + $0x20] sm:$0xff]   ;;  %v2974_v16 = vld [vmem:[%s3736_s3 + $0x28] sm:$0xff]   ;;  %v2980_v32 = vld [vmem:[%s3736_s3 + $0x50] sm:$0xff]  }
  0x58   : > { %2627 = vmatprep.subr.bf16.mxu1 %v3106_v0  ;;  %v2978_v29 = vld [vmem:[%s3736_s3 + $0x40] sm:$0xff]  }
  0x5a   : > { %2580 = vmatpush3.bf16.msra.mxu0 %v2925_v6  ;;  %v2960_v6 = vld [vmem:[%s3735_s2 + $0xb0] sm:$0xff]  }
  0x5b   : > { %2585 = vmatprep.subr.bf16.mxu0 %v3106_v0  ;;  %2628 = vmatpush3.bf16.msra.mxu1 %v2943_v33  ;;  %v2981_v33 = vld [vmem:[%s3736_s3 + $0x58] sm:$0xff]  }
  0x5c   : > { %2629 = vmatprep.subr.bf16.mxu1 %v3106_v0 }
  0x5d   : > { %2582 = vmatmul.mubr.msk.bf16.vlgmr.msra.gmra.mrb[0].mxu0 %vm491_vm1, %v442_v10 }
  0x5e   : > { %2586 = vmatpush3.bf16.msra.mxu0 %v2926_v11  ;;  %2597 = vmatprep.mubr.msk.bf16.mxu0 %vm3107_vm0, %v3106_v0  ;;  %v2966_v11 = vld [vmem:[%s3736_s3 + $0x8] sm:$0xff]  }
  0x5f   : > { %2587 = vmatprep.subr.bf16.mxu0 %v3106_v0  ;;  %2630 = vmatpush3.bf16.msra.mxu1 %v2944_v34  ;;  %v2982_v34 = vld [vmem:[%s3736_s3 + $0x60] sm:$0xff]  }
  0x60   : > { %2631 = vmatprep.subr.bf16.mxu1 %v3106_v0 }
  0x62   : > { %2588 = vmatpush3.bf16.msra.mxu0 %v2927_v13  ;;  %v2970_v13 = vld [vmem:[%s3736_s3 + $0x18] sm:$0xff]  }
  0x63   : > { %2589 = vmatprep.subr.bf16.mxu0 %v3106_v0  ;;  %2632 = vmatpush3.bf16.msra.mxu1 %v2945_v35  ;;  %v2983_v35 = vld [vmem:[%s3736_s3 + $0x68] sm:$0xff]  }
  0x64   : > { %2637 = vmatprep.subr.bf16.mxu1 %v3106_v0 }
  0x66   : > { %2590 = vmatpush3.bf16.msra.mxu0 %v2928_v15  ;;  %v2973_v15 = vld [vmem:[#allocation5 + $0x30] sm:$0xff]  }
  0x67   : > { %2591 = vmatprep.subr.bf16.mxu0 %v3106_v0 }
  0x6a   : > { %2592 = vmatpush3.bf16.msra.mxu0 %v2929_v17  ;;  %v2975_v17 = vld [vmem:[#allocation5 + $0x38] sm:$0xff]  }
  0x6b   : > { %2593 = vmatprep.subr.bf16.mxu0 %v3106_v0 }
  0x6e   : > { %2594 = vmatpush3.bf16.msra.mxu0 %v2930_v18  ;;  %v2976_v18 = vld [vmem:[%s3736_s3 + $0x30] sm:$0xff]  }
  0x6f   : > { %2595 = vmatprep.subr.bf16.mxu0 %v3106_v0 }
  0x72   : > { %2596 = vmatpush3.bf16.msra.mxu0 %v2931_v19  ;;  %v2977_v19 = vld [vmem:[%s3736_s3 + $0x38] sm:$0xff]  }
  0x73   : > { %2601 = vmatprep.subr.bf16.mxu0 %v3106_v0 }
  0x75   : > { %2598 = vmatmul.mubr.msk.bf16.vlgmr.msra.gmra.mrb[0].mxu0 %vm491_vm1, %v546_v23 }
  0x76   : > { %2602 = vmatpush3.bf16.msra.mxu0 %v2932_v22  ;;  %2613 = vmatprep.mubr.msk.bf16.mxu0 %vm3107_vm0, %v3106_v0 }
  0x77   : > { %2603 = vmatprep.subr.bf16.mxu0 %v3106_v0 }
  0x7a   : > { %2604 = vmatpush3.bf16.msra.mxu0 %v2933_v24 }
  0x7b   : > { %2605 = vmatprep.subr.bf16.mxu0 %v3106_v0 }
  0x7e   : > { %2606 = vmatpush3.bf16.msra.mxu0 %v2934_v25 }
  0x7f   : > { %2607 = vmatprep.subr.bf16.mxu0 %v3106_v0 }
  0x82   : > { %2608 = vmatpush3.bf16.msra.mxu0 %v2935_v26 }
  0x83   : > { %2609 = vmatprep.subr.bf16.mxu0 %v3106_v0 }
  0x86   : > { %2610 = vmatpush3.bf16.msra.mxu0 %v2936_v27 }
  0x87   : > { %2611 = vmatprep.subr.bf16.mxu0 %v3106_v0 }
  0x8a   : > { %2612 = vmatpush3.bf16.msra.mxu0 %v2937_v28 }
  0x8b   : > { %2677 = vmatprep.subr.bf16.mxu0 %v3106_v0 }
  0x8d   : > { %2614 = vmatmul.mubr.msk.bf16.vlgmr.msra.gmra.mrb[0].mxu0 %vm491_vm1, %v646_v31  ;;  %v2979_v31 = vld [vmem:[%s3736_s3 + $0x48] sm:$0xff]  }
  0x8e   : > { %2693 = vmatprep.mubr.msk.bf16.mxu0 %vm3107_vm0, %v3106_v0  ;;  %2678 = vmatpush3.bf16.msra.mxu0 %v2962_v36  ;;  %v2984_v36 = vld [vmem:[%s3736_s3 + $0x70] sm:$0xff]  }
  0x8f   : > { %2679 = vmatprep.subr.bf16.mxu0 %v3106_v0 }
  0x92   : > { %2680 = vmatpush3.bf16.msra.mxu0 %v2963_v37  ;;  %v2985_v37 = vld [vmem:[%s3736_s3 + $0x78] sm:$0xff]  }
  0x93   : > { %2681 = vmatprep.subr.bf16.mxu0 %v3106_v0 }
  0x96   : > { %2682 = vmatpush3.bf16.msra.mxu0 %v2965_v38 }
  0x97   : > { %2683 = vmatprep.subr.bf16.mxu0 %v3106_v0 }
  0x9a   : > { %2684 = vmatpush3.bf16.msra.mxu0 %v2967_v39  ;;  %v2986_v39 = vld [vmem:[%s3736_s3 + $0x80] sm:$0xff]  }
  0x9b   : > { %2685 = vmatprep.subr.bf16.mxu0 %v3106_v0 }
  0x9e   : > { %2686 = vmatpush3.bf16.msra.mxu0 %v2969_v40 }
  0x9f   : > { %2687 = vmatprep.subr.bf16.mxu0 %v3106_v0 }
  0xa2   : > { %2688 = vmatpush3.bf16.msra.mxu0 %v2971_v41  ;;  %v2987_v41 = vld [vmem:[%s3736_s3 + $0x88] sm:$0xff]  }
  0xa3   : > { %2689 = vmatprep.subr.bf16.mxu0 %v3106_v0 }
  0xa6   : > { %2690 = vmatpush3.bf16.msra.mxu0 %v2973_v15  ;;  %v3008_v15 = vld [vmem:[%s3737_s4 + $0x30] sm:$0xff]  }
  0xa7   : > { %2691 = vmatprep.subr.bf16.mxu0 %v3106_v0 }
  0xaa   : > { %2692 = vmatpush3.bf16.msra.mxu0 %v2975_v17 }
  0xab   : > { %2757 = vmatprep.subr.bf16.mxu0 %v3106_v0 }
 0x160   : > { %v733_v43 = vpop.f32.mrb[0].mxu0 }
 0x161   : > { %v2849_v44 = vadd.f32 %v2204_v42, %v733_v43  ;;  %v2615_v45 = vpop.f32.mrb[1].mxu0  ;;  %v2989_v43 = vld [vmem:[%s3736_s3 + $0x98] sm:$0xff]  }
 0x162   : > { %v736_v46 = vpop.f32.mrb[2].mxu0  ;;  %v2991_v45 = vld [vmem:[%s3736_s3 + $0xa8] sm:$0xff]  }
 0x163   : > { %v742_v47 = vmax.f32 %v2849_v44, 0.0  ;;  %v2850_v48 = vadd.f32 %v2204_v42, %v736_v46  ;;  %v2616_v49 = vpop.f32.mrb[3].mxu0  ;;  %v2988_v42 = vld [vmem:[%s3736_s3 + $0x90] sm:$0xff]   ;;  %v2990_v44 = vld [vmem:[%s3736_s3 + $0xa0] sm:$0xff]  }
 0x164   : > { %v2992_v46 = vld [vmem:[%s3736_s3 + $0xb0] sm:$0xff]  }
 0x165   : > { %744 = vst [vmem:[#allocation2 + $0x1] sm:$0xff] %v742_v47  ;;  %v743_v50 = vmax.f32 %v2850_v48, 0.0  ;;  %v2993_v47 = vld [vmem:[%s3736_s3 + $0xb8] sm:$0xff]  }
 0x167   : > { %745 = vst [vmem:[#allocation2 + $0x9] sm:$0xff] %v743_v50  ;;  %v2994_v50 = vld [vmem:[%s3739_s6] sm:$0xff]  }
 0x16e   : > { %v747_v51 = vld [vmem:[#allocation2] ss:$2 sm:$0xff]  ;;  %v859_v61 = vld [vmem:[#allocation2 + $0x1] ss:$2 sm:$0xff] }
 0x16f   : > { %v748_v53 = vpack.c.bf16 %v747_v51, %v747_v51  ;;  %v860_v63 = vpack.c.bf16 %v859_v61, %v859_v61  ;;  %v968_v8 = vld [vmem:[#allocation2 + $0x2] ss:$2 sm:$0xff] }
 0x170   : > { %v969_v10 = vpack.c.bf16 %v968_v8, %v968_v8  ;;  %v2995_v51 = vld [vmem:[%s3739_s6 + $0x8] sm:$0xff]   ;;  %v3002_v8 = vld [vmem:[%s3737_s4] sm:$0xff]  }
 0x171   : > { %2634 = vmatmul.mubr.bf16.vlgmr.msra.gmra.mrb[0].mxu1 %v748_v53  ;;  %v2997_v53 = vld [vmem:[%s3739_s6 + $0x18] sm:$0xff]  }
 0x172   : > { %2638 = vmatpush3.bf16.msra.mxu1 %v2946_v52  ;;  %2653 = vmatprep.mubr.msk.bf16.mxu1 %vm3107_vm0, %v3106_v0  ;;  %v2996_v52 = vld [vmem:[%s3739_s6 + $0x10] sm:$0xff]  }
 0x173   : > { %2639 = vmatprep.subr.bf16.mxu1 %v3106_v0 }
 0x176   : > { %2640 = vmatpush3.bf16.msra.mxu1 %v2947_v54  ;;  %v2998_v54 = vld [vmem:[%s3739_s6 + $0x20] sm:$0xff]  }
 0x177   : > { %2641 = vmatprep.subr.bf16.mxu1 %v3106_v0 }
 0x17a   : > { %2642 = vmatpush3.bf16.msra.mxu1 %v2948_v55  ;;  %v2999_v55 = vld [vmem:[%s3739_s6 + $0x28] sm:$0xff]  }
 0x17b   : > { %2643 = vmatprep.subr.bf16.mxu1 %v3106_v0 }
 0x17e   : > { %2644 = vmatpush3.bf16.msra.mxu1 %v2949_v56  ;;  %v3000_v56 = vld [vmem:[%s3739_s6 + $0x30] sm:$0xff]  }
 0x17f   : > { %2645 = vmatprep.subr.bf16.mxu1 %v3106_v0 }
 0x182   : > { %2646 = vmatpush3.bf16.msra.mxu1 %v2950_v57  ;;  %v3001_v57 = vld [vmem:[%s3739_s6 + $0x38] sm:$0xff]  }
 0x183   : > { %2647 = vmatprep.subr.bf16.mxu1 %v3106_v0 }
 0x186   : > { %2648 = vmatpush3.bf16.msra.mxu1 %v2951_v58  ;;  %v2304_v58 = vld [vmem:[#allocation7 + $0x4] ss:$0 sm:$0xff] }
 0x187   : > { %2649 = vmatprep.subr.bf16.mxu1 %v3106_v0 }
 0x18a   : > { %2650 = vmatpush3.bf16.msra.mxu1 %v2952_v59 }
 0x18b   : > { %2651 = vmatprep.subr.bf16.mxu1 %v3106_v0 }
 0x18e   : > { %2652 = vmatpush3.bf16.msra.mxu1 %v2953_v60 }
 0x18f   : > { %2657 = vmatprep.subr.bf16.mxu1 %v3106_v0 }
 0x191   : > { %2654 = vmatmul.mubr.bf16.vlgmr.msra.gmra.mrb[0].mxu1 %v860_v63 }
 0x192   : > { %2658 = vmatpush3.bf16.msra.mxu1 %v2954_v62  ;;  %2673 = vmatprep.mubr.msk.bf16.mxu1 %vm3107_vm0, %v3106_v0 }
 0x193   : > { %2659 = vmatprep.subr.bf16.mxu1 %v3106_v0 }
 0x196   : > { %2660 = vmatpush3.bf16.msra.mxu1 %v2955_v1  ;;  %v2321_v1 = vld [vmem:[#allocation7 + $0x2] ss:$0 sm:$0xff] }
 0x197   : > { %2661 = vmatprep.subr.bf16.mxu1 %v3106_v0 }
 0x19a   : > { %2662 = vmatpush3.bf16.msra.mxu1 %v2956_v2 }
 0x19b   : > { %2663 = vmatprep.subr.bf16.mxu1 %v3106_v0 }
 0x19e   : > { %2664 = vmatpush3.bf16.msra.mxu1 %v2957_v3 }
 0x19f   : > { %2665 = vmatprep.subr.bf16.mxu1 %v3106_v0 }
 0x1a2   : > { %2666 = vmatpush3.bf16.msra.mxu1 %v2958_v4 }
 0x1a3   : > { %2667 = vmatprep.subr.bf16.mxu1 %v3106_v0 }
 0x1a6   : > { %2668 = vmatpush3.bf16.msra.mxu1 %v2959_v5 }
 0x1a7   : > { %2669 = vmatprep.subr.bf16.mxu1 %v3106_v0 }
 0x1aa   : > { %2670 = vmatpush3.bf16.msra.mxu1 %v2960_v6 }
 0x1ab   : > { %2671 = vmatprep.subr.bf16.mxu1 %v3106_v0 }
 0x1ae   : > { %2672 = vmatpush3.bf16.msra.mxu1 %v2961_v7 }
 0x1af   : > { %2697 = vmatprep.subr.bf16.mxu1 %v3106_v0 }
 0x1b1   : > { %2674 = vmatmul.mubr.bf16.vlgmr.msra.gmra.mrb[0].mxu1 %v969_v10  ;;  %v3003_v10 = vld [vmem:[%s3737_s4 + $0x8] sm:$0xff]  }
 0x1b2   : > { %2698 = vmatpush3.bf16.msra.mxu1 %v2964_v9  ;;  %2713 = vmatprep.mubr.msk.bf16.mxu1 %vm3107_vm0, %v3106_v0 }
 0x1b3   : > { %2699 = vmatprep.subr.bf16.mxu1 %v3106_v0 }
 0x1b6   : > { %2700 = vmatpush3.bf16.msra.mxu1 %v2966_v11  ;;  %v3004_v11 = vld [vmem:[%s3737_s4 + $0x10] sm:$0xff]  }
 0x1b7   : > { %2701 = vmatprep.subr.bf16.mxu1 %v3106_v0 }
 0x1ba   : > { %2702 = vmatpush3.bf16.msra.mxu1 %v2968_v12  ;;  %v3005_v12 = vld [vmem:[%s3737_s4 + $0x18] sm:$0xff]  }
 0x1bb   : > { %2703 = vmatprep.subr.bf16.mxu1 %v3106_v0 }
 0x1be   : > { %2704 = vmatpush3.bf16.msra.mxu1 %v2970_v13  ;;  %v3006_v13 = vld [vmem:[%s3737_s4 + $0x20] sm:$0xff]  }
 0x1bf   : > { %2705 = vmatprep.subr.bf16.mxu1 %v3106_v0 }
 0x1c2   : > { %2706 = vmatpush3.bf16.msra.mxu1 %v2972_v14  ;;  %v3007_v14 = vld [vmem:[%s3737_s4 + $0x28] sm:$0xff]  }
 0x1c3   : > { %2707 = vmatprep.subr.bf16.mxu1 %v3106_v0 }
 0x1c6   : > { %2708 = vmatpush3.bf16.msra.mxu1 %v2974_v16  ;;  %v3009_v16 = vld [vmem:[%s3737_s4 + $0x38] sm:$0xff]  }
 0x1c7   : > { %2709 = vmatprep.subr.bf16.mxu1 %v3106_v0 }
 0x1ca   : > { %2710 = vmatpush3.bf16.msra.mxu1 %v2976_v18  ;;  %v3010_v18 = vld [vmem:[%s3737_s4 + $0x40] sm:$0xff]  }
 0x1cb   : > { %2711 = vmatprep.subr.bf16.mxu1 %v3106_v0 }
 0x1ce   : > { %2712 = vmatpush3.bf16.msra.mxu1 %v2977_v19 }
 0x1cf   : > { %2717 = vmatprep.subr.bf16.mxu1 %v3106_v0 }
 0x284   : > { %v1069_v21 = vpop.f32.mrb[0].mxu1 }
 0x285   : > { %v2851_v22 = vadd.f32 %v2255_v20, %v1069_v21  ;;  %v2675_v23 = vpop.f32.mrb[1].mxu1  ;;  %v3011_v20 = vld [vmem:[%s3737_s4 + $0x48] sm:$0xff]   ;;  %v3012_v21 = vld [vmem:[%s3737_s4 + $0x50] sm:$0xff]  }
 0x286   : > { %v1072_v24 = vpop.f32.mrb[2].mxu1  ;;  %v3014_v23 = vld [vmem:[%s3737_s4 + $0x60] sm:$0xff]  }
 0x287   : > { %v1076_v25 = vmax.f32 %v2851_v22, 0.0  ;;  %v2676_v26 = vpop.f32.mrb[3].mxu1  ;;  %v3013_v22 = vld [vmem:[%s3737_s4 + $0x58] sm:$0xff]   ;;  %v3015_v24 = vld [vmem:[%s3737_s4 + $0x68] sm:$0xff]  }
 0x288   : > { %v3017_v26 = vld [vmem:[%s3737_s4 + $0x78] sm:$0xff]  }
 0x289   : > { %1077 = vst [vmem:[#allocation3 + $0x1] sm:$0xff] %v1076_v25  ;;  %v1078_v27 = vpack.c.bf16 %v1076_v25, %v1076_v25  ;;  %v3016_v25 = vld [vmem:[%s3737_s4 + $0x70] sm:$0xff]  }
 0x28b   : > { %2694 = vmatmul.mubr.bf16.vlgmr.msra.gmra.mrb[4].mxu0 %v1078_v27 }
 0x28c   : > { %2773 = vmatprep.mubr.msk.bf16.mxu0 %vm3107_vm0, %v3106_v0  ;;  %2758 = vmatpush3.bf16.msra.mxu0 %v2994_v50 }
 0x28d   : > { %2759 = vmatprep.subr.bf16.mxu0 %v3106_v0 }
 0x290   : > { %v1190_v28 = vld [vmem:[#allocation3] ss:$2 sm:$0xf]  ;;  %v1302_v38 = vld [vmem:[#allocation3 + $0x1] ss:$2 sm:$0xf]  ;;  %2760 = vmatpush3.bf16.msra.mxu0 %v2995_v51 }
 0x291   : > { %v1191_v30 = vpack.c.bf16 %v1190_v28, %v1190_v28  ;;  %v1303_v40 = vpack.c.bf16 %v1302_v38, %v1302_v38  ;;  %v1411_v48 = vld [vmem:[#allocation3 + $0x2] ss:$2 sm:$0xf]  ;;  %2761 = vmatprep.subr.bf16.mxu0 %v3106_v0 }
 0x292   : > { %v1412_v49 = vpack.c.bf16 %v1411_v48, %v1411_v48  ;;  %v3018_v28 = vld [vmem:[%s3737_s4 + $0x80] sm:$0xff]   ;;  %v3025_v38 = vld [vmem:[%s3737_s4 + $0xb8] sm:$0xff]  }
 0x293   : > { %2714 = vmatmul.mubr.bf16.vlgmr.msra.gmra.mrb[4].mxu1 %v1191_v30  ;;  %v3019_v30 = vld [vmem:[%s3737_s4 + $0x88] sm:$0xff]  }
 0x294   : > { %2718 = vmatpush3.bf16.msra.mxu1 %v2978_v29  ;;  %2733 = vmatprep.mubr.msk.bf16.mxu1 %vm3107_vm0, %v3106_v0 }
 0x295   : > { %2719 = vmatprep.subr.bf16.mxu1 %v3106_v0  ;;  %2762 = vmatpush3.bf16.msra.mxu0 %v2996_v52 }
 0x296   : > { %2763 = vmatprep.subr.bf16.mxu0 %v3106_v0 }
 0x298   : > { %2720 = vmatpush3.bf16.msra.mxu1 %v2979_v31  ;;  %v3020_v31 = vld [vmem:[%s3737_s4 + $0x90] sm:$0xff]  }
 0x299   : > { %2721 = vmatprep.subr.bf16.mxu1 %v3106_v0  ;;  %2764 = vmatpush3.bf16.msra.mxu0 %v2997_v53 }
 0x29a   : > { %2765 = vmatprep.subr.bf16.mxu0 %v3106_v0 }
 0x29c   : > { %2722 = vmatpush3.bf16.msra.mxu1 %v2980_v32  ;;  %v3021_v32 = vld [vmem:[%s3737_s4 + $0x98] sm:$0xff]  }
 0x29d   : > { %2723 = vmatprep.subr.bf16.mxu1 %v3106_v0  ;;  %2766 = vmatpush3.bf16.msra.mxu0 %v2998_v54 }
 0x29e   : > { %2767 = vmatprep.subr.bf16.mxu0 %v3106_v0 }
 0x2a0   : > { %2724 = vmatpush3.bf16.msra.mxu1 %v2981_v33  ;;  %v3022_v33 = vld [vmem:[%s3737_s4 + $0xa0] sm:$0xff]  }
 0x2a1   : > { %2725 = vmatprep.subr.bf16.mxu1 %v3106_v0  ;;  %2768 = vmatpush3.bf16.msra.mxu0 %v2999_v55 }
 0x2a2   : > { %2769 = vmatprep.subr.bf16.mxu0 %v3106_v0 }
 0x2a4   : > { %2726 = vmatpush3.bf16.msra.mxu1 %v2982_v34  ;;  %v3023_v34 = vld [vmem:[%s3737_s4 + $0xa8] sm:$0xff]  }
 0x2a5   : > { %2727 = vmatprep.subr.bf16.mxu1 %v3106_v0  ;;  %2770 = vmatpush3.bf16.msra.mxu0 %v3000_v56  ;;  %v2436_v56 = vld [vmem:[#allocation7 + $0x6] ss:$0 sm:$0xff] }
 0x2a6   : > { %2771 = vmatprep.subr.bf16.mxu0 %v3106_v0 }
 0x2a8   : > { %2728 = vmatpush3.bf16.msra.mxu1 %v2983_v35  ;;  %v3024_v35 = vld [vmem:[%s3737_s4 + $0xb0] sm:$0xff]  }
 0x2a9   : > { %2729 = vmatprep.subr.bf16.mxu1 %v3106_v0  ;;  %2772 = vmatpush3.bf16.msra.mxu0 %v3001_v57 }
 0x2aa   : > { %2777 = vmatprep.subr.bf16.mxu0 %v3106_v0 }
 0x2ac   : > { %2730 = vmatpush3.bf16.msra.mxu1 %v2984_v36  ;;  %v3026_v36 = vld [vmem:[%s3740_s7] sm:$0xff]  }
 0x2ad   : > { %2731 = vmatprep.subr.bf16.mxu1 %v3106_v0 }
 0x2b0   : > { %2732 = vmatpush3.bf16.msra.mxu1 %v2985_v37  ;;  %v3027_v37 = vld [vmem:[%s3740_s7 + $0x8] sm:$0xff]  }
 0x2b1   : > { %2737 = vmatprep.subr.bf16.mxu1 %v3106_v0 }
 0x2b3   : > { %2734 = vmatmul.mubr.bf16.vlgmr.msra.gmra.mrb[4].mxu1 %v1303_v40 }
 0x2b4   : > { %2738 = vmatpush3.bf16.msra.mxu1 %v2986_v39  ;;  %2753 = vmatprep.mubr.msk.bf16.mxu1 %vm3107_vm0, %v3106_v0 }
 0x2b5   : > { %2739 = vmatprep.subr.bf16.mxu1 %v3106_v0 }
 0x2b8   : > { %2740 = vmatpush3.bf16.msra.mxu1 %v2987_v41  ;;  %v3028_v41 = vld [vmem:[%s3740_s7 + $0x10] sm:$0xff]  }
 0x2b9   : > { %2741 = vmatprep.subr.bf16.mxu1 %v3106_v0 }
 0x2bc   : > { %2742 = vmatpush3.bf16.msra.mxu1 %v2988_v42  ;;  %v3029_v42 = vld [vmem:[%s3740_s7 + $0x18] sm:$0xff]  }
 0x2bd   : > { %2743 = vmatprep.subr.bf16.mxu1 %v3106_v0 }
 0x2c0   : > { %2744 = vmatpush3.bf16.msra.mxu1 %v2989_v43  ;;  %v2370_v43 = vld [vmem:[#allocation7 + $0x5] ss:$0 sm:$0xff] }
 0x2c1   : > { %2745 = vmatprep.subr.bf16.mxu1 %v3106_v0 }
 0x2c4   : > { %2746 = vmatpush3.bf16.msra.mxu1 %v2990_v44 }
 0x2c5   : > { %2747 = vmatprep.subr.bf16.mxu1 %v3106_v0 }
 0x2c8   : > { %2748 = vmatpush3.bf16.msra.mxu1 %v2991_v45 }
 0x2c9   : > { %2749 = vmatprep.subr.bf16.mxu1 %v3106_v0 }
 0x2cc   : > { %2750 = vmatpush3.bf16.msra.mxu1 %v2992_v46 }
 0x2cd   : > { %2751 = vmatprep.subr.bf16.mxu1 %v3106_v0 }
 0x2d0   : > { %2752 = vmatpush3.bf16.msra.mxu1 %v2993_v47 }
 0x2d1   : > { %2837 = vmatprep.subr.bf16.mxu1 %v3106_v0 }
 0x2d3   : > { %2754 = vmatmul.mubr.bf16.vlgmr.msra.gmra.mrb[4].mxu1 %v1412_v49  ;;  %v2387_v49 = vld [vmem:[#allocation7 + $0x3] ss:$0 sm:$0xff] }
 0x2d4   : > { %2845 = vmatprep.mubr.msk.bf16.mxu1 %vm3107_vm0, %v3106_v0  ;;  %2838 = vmatpush3.bf16.msra.mxu1 %v3026_v36 }
 0x2d5   : > { %2839 = vmatprep.subr.bf16.mxu1 %v3106_v0 }
 0x2d8   : > { %2840 = vmatpush3.bf16.msra.mxu1 %v3027_v37 }
 0x2d9   : > { %2841 = vmatprep.subr.bf16.mxu1 %v3106_v0 }
 0x2dc   : > { %2842 = vmatpush3.bf16.msra.mxu1 %v3028_v41 }
 0x2dd   : > { %2843 = vmatprep.subr.bf16.mxu1 %v3106_v0 }
 0x2e0   : > { %2844 = vmatpush3.bf16.msra.mxu1 %v3029_v42 }
 0x35e   : > { %v1182_v59 = vpop.f32.mrb[4].mxu0 }
 0x35f   : > { %v1183_v60 = vadd.f32 %v2304_v58, %v1182_v59  ;;  %v2695_v61 = vpop.f32.mrb[5].mxu0 }
 0x360   : > { %v1185_v62 = vpop.f32.mrb[6].mxu0 }
 0x361   : > { %1188 = vst [vmem:[%s425_s14] sm:$0xff] %v1183_v60  ;;  %v2696_v63 = vpop.f32.mrb[7].mxu0 }
 0x3a6   : > { %v1512_v2 = vpop.f32.mrb[4].mxu1 }
 0x3a7   : > { %v2852_v3 = vadd.f32 %v2321_v1, %v1512_v2  ;;  %v2755_v4 = vpop.f32.mrb[5].mxu1 }
 0x3a8   : > { %v1515_v5 = vpop.f32.mrb[6].mxu1 }
 0x3a9   : > { %v1519_v6 = vmax.f32 %v2852_v3, 0.0  ;;  %v2756_v7 = vpop.f32.mrb[7].mxu1 }
 0x3ab   : > { %1520 = vst [vmem:[#allocation4 + $0x1] sm:$0xf] %v1519_v6  ;;  %v1521_v9 = vpack.c.bf16 %v1519_v6, %v1519_v6 }
 0x3ad   : > { %2774 = vmatmul.mubr.bf16.vlgmr.msra.gmra.mrb[8].mxu0 %v1521_v9 }
 0x3ae   : > { %2778 = vmatpush3.bf16.msra.mxu0 %v3002_v8  ;;  %2793 = vmatprep.mubr.msk.bf16.mxu0 %vm3107_vm0, %v3106_v0 }
 0x3af   : > { %2779 = vmatprep.subr.bf16.mxu0 %v3106_v0 }
 0x3b2   : > { %2780 = vmatpush3.bf16.msra.mxu0 %v3003_v10  ;;  %v1633_v17 = vld [vmem:[#allocation4] ss:$2 sm:$0x3]  ;;  %v1745_v27 = vld [vmem:[#allocation4 + $0x1] ss:$2 sm:$0x3] }
 0x3b3   : > { %2781 = vmatprep.subr.bf16.mxu0 %v3106_v0  ;;  %v1634_v19 = vpack.c.bf16 %v1633_v17, %v1633_v17  ;;  %v1746_v29 = vpack.c.bf16 %v1745_v27, %v1745_v27  ;;  %v1854_v39 = vld [vmem:[#allocation4 + $0x2] ss:$2 sm:$0x3] }
 0x3b4   : > { %v1855_v40 = vpack.c.bf16 %v1854_v39, %v1854_v39 }
 0x3b6   : > { %2782 = vmatpush3.bf16.msra.mxu0 %v3004_v11 }
 0x3b7   : > { %2783 = vmatprep.subr.bf16.mxu0 %v3106_v0 }
 0x3ba   : > { %2784 = vmatpush3.bf16.msra.mxu0 %v3005_v12 }
 0x3bb   : > { %2785 = vmatprep.subr.bf16.mxu0 %v3106_v0 }
 0x3be   : > { %2786 = vmatpush3.bf16.msra.mxu0 %v3006_v13 }
 0x3bf   : > { %2787 = vmatprep.subr.bf16.mxu0 %v3106_v0 }
 0x3c2   : > { %2788 = vmatpush3.bf16.msra.mxu0 %v3007_v14 }
 0x3c3   : > { %2789 = vmatprep.subr.bf16.mxu0 %v3106_v0 }
 0x3c6   : > { %2790 = vmatpush3.bf16.msra.mxu0 %v3008_v15 }
 0x3c7   : > { %2791 = vmatprep.subr.bf16.mxu0 %v3106_v0 }
 0x3ca   : > { %2792 = vmatpush3.bf16.msra.mxu0 %v3009_v16 }
 0x3cb   : > { %2797 = vmatprep.subr.bf16.mxu0 %v3106_v0 }
 0x3cd   : > { %2794 = vmatmul.mubr.bf16.vlgmr.msra.gmra.mrb[12].mxu0 %v1634_v19 }
 0x3ce   : > { %2798 = vmatpush3.bf16.msra.mxu0 %v3010_v18  ;;  %2813 = vmatprep.mubr.msk.bf16.mxu0 %vm3107_vm0, %v3106_v0 }
 0x3cf   : > { %2799 = vmatprep.subr.bf16.mxu0 %v3106_v0 }
 0x3d2   : > { %2800 = vmatpush3.bf16.msra.mxu0 %v3011_v20 }
 0x3d3   : > { %2801 = vmatprep.subr.bf16.mxu0 %v3106_v0 }
 0x3d6   : > { %2802 = vmatpush3.bf16.msra.mxu0 %v3012_v21 }
 0x3d7   : > { %2803 = vmatprep.subr.bf16.mxu0 %v3106_v0 }
 0x3da   : > { %2804 = vmatpush3.bf16.msra.mxu0 %v3013_v22 }
 0x3db   : > { %2805 = vmatprep.subr.bf16.mxu0 %v3106_v0 }
 0x3de   : > { %2806 = vmatpush3.bf16.msra.mxu0 %v3014_v23 }
 0x3df   : > { %2807 = vmatprep.subr.bf16.mxu0 %v3106_v0 }
 0x3e2   : > { %2808 = vmatpush3.bf16.msra.mxu0 %v3015_v24 }
 0x3e3   : > { %2809 = vmatprep.subr.bf16.mxu0 %v3106_v0 }
 0x3e6   : > { %2810 = vmatpush3.bf16.msra.mxu0 %v3016_v25 }
 0x3e7   : > { %2811 = vmatprep.subr.bf16.mxu0 %v3106_v0 }
 0x3ea   : > { %2812 = vmatpush3.bf16.msra.mxu0 %v3017_v26 }
 0x3eb   : > { %2817 = vmatprep.subr.bf16.mxu0 %v3106_v0 }
 0x3ed   : > { %2814 = vmatmul.mubr.bf16.vlgmr.msra.gmra.mrb[12].mxu0 %v1746_v29 }
 0x3ee   : > { %2818 = vmatpush3.bf16.msra.mxu0 %v3018_v28  ;;  %2833 = vmatprep.mubr.msk.bf16.mxu0 %vm3107_vm0, %v3106_v0 }
 0x3ef   : > { %2819 = vmatprep.subr.bf16.mxu0 %v3106_v0 }
 0x3f2   : > { %2820 = vmatpush3.bf16.msra.mxu0 %v3019_v30 }
 0x3f3   : > { %2821 = vmatprep.subr.bf16.mxu0 %v3106_v0 }
 0x3f6   : > { %2822 = vmatpush3.bf16.msra.mxu0 %v3020_v31 }
 0x3f7   : > { %2823 = vmatprep.subr.bf16.mxu0 %v3106_v0 }
 0x3fa   : > { %2824 = vmatpush3.bf16.msra.mxu0 %v3021_v32 }
 0x3fb   : > { %2825 = vmatprep.subr.bf16.mxu0 %v3106_v0 }
 0x3fe   : > { %2826 = vmatpush3.bf16.msra.mxu0 %v3022_v33 }
 0x3ff   : > { %2827 = vmatprep.subr.bf16.mxu0 %v3106_v0 }
 0x402   : > { %2828 = vmatpush3.bf16.msra.mxu0 %v3023_v34 }
 0x403   : > { %2829 = vmatprep.subr.bf16.mxu0 %v3106_v0 }
 0x406   : > { %2830 = vmatpush3.bf16.msra.mxu0 %v3024_v35 }
 0x407   : > { %2831 = vmatprep.subr.bf16.mxu0 %v3106_v0 }
 0x40a   : > { %2832 = vmatpush3.bf16.msra.mxu0 %v3025_v38 }
 0x40d   : > { %2834 = vmatmul.mubr.bf16.vlgmr.msra.gmra.mrb[12].mxu0 %v1855_v40 }
 0x480   : > { %v1625_v44 = vpop.f32.mrb[8].mxu0 }
 0x481   : > { %v1626_v45 = vadd.f32 %v2370_v43, %v1625_v44  ;;  %v2775_v46 = vpop.f32.mrb[9].mxu0 }
 0x482   : > { %v1628_v47 = vpop.f32.mrb[10].mxu0 }
 0x483   : > { %1631 = vst [vmem:[%s429_s29] sm:$0xf] %v1626_v45  ;;  %v2776_v48 = vpop.f32.mrb[11].mxu0 }
 0x4e0   : > { %v1955_v0 = vpop.f32.mrb[12].mxu0 }
 0x4e1   : > { %v2853_v50 = vadd.f32 %v2387_v49, %v1955_v0  ;;  %v2835_v51 = vpop.f32.mrb[13].mxu0 }
 0x4e2   : > { %v1958_v52 = vpop.f32.mrb[14].mxu0 }
 0x4e3   : > { %v1962_v53 = vmax.f32 %v2853_v50, 0.0  ;;  %v2836_v54 = vpop.f32.mrb[15].mxu0 }
 0x4e5   : > { %v1963_v55 = vpack.c.bf16 %v1962_v53, %v1962_v53 }
 0x4e7   : > { %2846 = vmatmul.mubr.msk.bf16.vlgmr.msra.gmra.mrb[8].mxu1 %vm2001_vm2, %v1963_v55 }
 0x5ba   : > { %v2039_v57 = vpop.f32.mrb[8].mxu1 }
 0x5bb   : > { %v2040_v58 = vadd.f32 %v2436_v56, %v2039_v57  ;;  %v2847_v59 = vpop.f32.mrb[9].mxu1 }
 0x5bc   : > { %v2042_v60 = vpop.f32.mrb[10].mxu1 }
 0x5bd   : > { %2045 = vst [vmem:[%s433_s21] sm:$0x3] %v2040_v58  ;;  %v2848_v61 = vpop.f32.mrb[11].mxu1 }
 0x5be PF: > { %s24_s17 = sadd.s32 1, %s3100_s17  }
 0x5bf   : > { %p21_p9 = scmp.ge.s32.totalorder %s24_s17, 4  }
 0x5c1   :  { %23 = sbr.rel (!%p21_p9) target bundleno = 2 (0x2), region = 138 }
 0x5c8   :  { %2093 = vsyncpa [#allocation6], 1 }
 0x5c9   :  { %2095 = vsyncpa [#allocation6 + $0x1], 1 }
 0x5ca   :  { %2096 = vsyncpa [#allocation8], 1 }

</bundles_post_ra>
